<compile_context>
chip_gen: v6e
topology: v6e:2x2x1
jax: 0.10.0
libtpu: 0.0.40
codegen_flags: <defaults>
</compile_context>

<pallas_src>
import functools
import math

import jax
import jax.numpy as jnp
from jax.experimental import pallas as pl
from jax.experimental.pallas import tpu as pltpu

_BN_EPS = 1e-5
_LANE = 128
_VMEM_LIMIT = 32 * 1024 * 1024  # explicit scoped-VMEM limit (safe on v5e/v6e/v7x)


# ------------------------------ small helpers ------------------------------

def _round_up(x, m):
    return (x + m - 1) // m * m


def _pick_tile(dim, max_tile, align):
    """Largest multiple of `align` that divides `dim` (dim is align-aligned)."""
    best = align
    t = align
    limit = min(dim, max_tile)
    while t <= limit:
        if dim % t == 0:
            best = t
        t += align
    return best


# ----------------------------- Pallas kernels ------------------------------

def _matmul_bn_kernel(x_ref, w_ref, scale_ref, shift_ref, o_ref, acc_ref,
                      *, apply_relu):
    @pl.when(pl.program_id(2) == 0)
    def _():
        acc_ref[...] = jnp.zeros_like(acc_ref)

    acc_ref[...] += jnp.dot(x_ref[...], w_ref[...],
                            preferred_element_type=jnp.float32)

    @pl.when(pl.program_id(2) == pl.num_programs(2) - 1)
    def _():
        acc = acc_ref[...] * scale_ref[...] + shift_ref[...]
        if apply_relu:
            acc = jnp.maximum(acc, 0.0)
        o_ref[...] = acc.astype(o_ref.dtype)


def _matmul_bn_res_kernel(x_ref, w_ref, scale_ref, shift_ref, res_ref, o_ref,
                          acc_ref, *, apply_relu):
    @pl.when(pl.program_id(2) == 0)
    def _():
        acc_ref[...] = jnp.zeros_like(acc_ref)

    acc_ref[...] += jnp.dot(x_ref[...], w_ref[...],
                            preferred_element_type=jnp.float32)

    @pl.when(pl.program_id(2) == pl.num_programs(2) - 1)
    def _():
        acc = (acc_ref[...] * scale_ref[...] + shift_ref[...]
               + res_ref[...].astype(jnp.float32))
        if apply_relu:
            acc = jnp.maximum(acc, 0.0)
        o_ref[...] = acc.astype(o_ref.dtype)


def _maxpool9_kernel(x0, x1, x2, x3, x4, x5, x6, x7, x8, o_ref):
    m = jnp.maximum(
        jnp.maximum(jnp.maximum(x0[...], x1[...]),
                    jnp.maximum(x2[...], x3[...])),
        jnp.maximum(jnp.maximum(x4[...], x5[...]),
                    jnp.maximum(x6[...], x7[...])))
    o_ref[...] = jnp.maximum(m, x8[...])


def _head_kernel(x_ref, w1_ref, b1_ref, w2_ref, b2_ref, o_ref, *, inv_hw):
    # global average pool (f32) -> Linear -> ReLU -> Linear -> ReLU
    pooled = jnp.sum(x_ref[...].astype(jnp.float32), axis=1) * inv_hw
    h = jnp.dot(pooled.astype(jnp.bfloat16), w1_ref[...],
                preferred_element_type=jnp.float32)
    h = jnp.maximum(h + b1_ref[...], 0.0)
    o = jnp.dot(h.astype(jnp.bfloat16), w2_ref[...],
                preferred_element_type=jnp.float32)
    o = jnp.maximum(o + b2_ref[...], 0.0)   # reference applies ReLU on the head
    o_ref[...] = o.astype(o_ref.dtype)


# ----------------------------- Pallas wrappers -----------------------------

def fused_matmul_bn(x, w, scale, shift, residual=None, apply_relu=True,
                    out_dtype=jnp.bfloat16):
    """out = maybe_relu((x @ w) * scale + shift [+ residual]); tiled + pipelined."""
    M, K = x.shape
    K2, N = w.shape
    assert K == K2

    Mp = _round_up(max(M, 8), 8)
    Kp = _round_up(max(K, _LANE), _LANE)
    Np = _round_up(max(N, _LANE), _LANE)
    tm = _pick_tile(Mp, 512, 8)
    tk = _pick_tile(Kp, 512, _LANE)
    tn = _pick_tile(Np, 256, _LANE)

    xp = x.astype(jnp.bfloat16)
    if (Mp, Kp) != (M, K):
        xp = jnp.pad(xp, ((0, Mp - M), (0, Kp - K)))
    wp = w.astype(jnp.bfloat16)
    if (Kp, Np) != (K, N):
        wp = jnp.pad(wp, ((0, Kp - K), (0, Np - N)))
    scale2 = scale.reshape(1, N).astype(jnp.float32)
    shift2 = shift.reshape(1, N).astype(jnp.float32)
    if Np != N:
        scale2 = jnp.pad(scale2, ((0, 0), (0, Np - N)))
        shift2 = jnp.pad(shift2, ((0, 0), (0, Np - N)))

    in_specs = [
        pl.BlockSpec((tm, tk), lambda i, j, k: (i, k)),
        pl.BlockSpec((tk, tn), lambda i, j, k: (k, j)),
        pl.BlockSpec((1, tn), lambda i, j, k: (0, j)),
        pl.BlockSpec((1, tn), lambda i, j, k: (0, j)),
    ]
    args = [xp, wp, scale2, shift2]
    res_bytes = 0
    if residual is not None:
        rp = residual.astype(jnp.bfloat16)
        if (Mp, Np) != residual.shape:
            rp = jnp.pad(rp, ((0, Mp - M), (0, Np - N)))
        in_specs.append(pl.BlockSpec((tm, tn), lambda i, j, k: (i, j)))
        args.append(rp)
        kern = functools.partial(_matmul_bn_res_kernel, apply_relu=apply_relu)
        res_bytes = Mp * Np * 2
    else:
        kern = functools.partial(_matmul_bn_kernel, apply_relu=apply_relu)

    grid = (Mp // tm, Np // tn, Kp // tk)
    cost = pl.CostEstimate(
        flops=2 * Mp * Np * Kp,
        transcendentals=0,
        bytes_accessed=(Mp * Kp + Kp * Np) * 2 + Mp * Np * 2 + res_bytes
                       + 2 * Np * 4)

    out = pl.pallas_call(
        kern,
        out_shape=jax.ShapeDtypeStruct((Mp, Np), out_dtype),
        grid_spec=pltpu.PrefetchScalarGridSpec(
            num_scalar_prefetch=0,
            grid=grid,
            in_specs=in_specs,
            out_specs=pl.BlockSpec((tm, tn), lambda i, j, k: (i, j)),
            scratch_shapes=[pltpu.VMEM((tm, tn), jnp.float32)]),
        compiler_params=pltpu.CompilerParams(
            dimension_semantics=("parallel", "parallel", "arbitrary"),
            vmem_limit_bytes=_VMEM_LIMIT),
        cost_estimate=cost,
    )(*args)

    if (Mp, Np) != (M, N):
        out = out[:M, :N]
    return out


def max_pool_3x3_s2(x):
    """MaxPool2d(kernel=3, stride=2, padding=0) on NHWC via a max tree."""
    N, H, W, C = x.shape
    Ho = (H - 3) // 2 + 1
    Wo = (W - 3) // 2 + 1
    M = N * Ho * Wo
    slabs = []
    for i in range(3):
        for j in range(3):
            s = jax.lax.slice(
                x, (0, i, j, 0),
                (N, i + (Ho - 1) * 2 + 1, j + (Wo - 1) * 2 + 1, C),
                (1, 2, 2, 1))
            slabs.append(s.reshape(M, C))
    Mp = _round_up(max(M, 8), 8)
    if Mp != M:
        slabs = [jnp.pad(s, ((0, Mp - M), (0, 0))) for s in slabs]
    tm = _pick_tile(Mp, 1024, 8)
    tc = _pick_tile(C, 512, _LANE) if C % _LANE == 0 else C
    spec = pl.BlockSpec((tm, tc), lambda i, j: (i, j))
    out = pl.pallas_call(
        _maxpool9_kernel,
        out_shape=jax.ShapeDtypeStruct((Mp, C), x.dtype),
        grid=(Mp // tm, C // tc),
        in_specs=[spec] * 9,
        out_specs=spec,
        compiler_params=pltpu.CompilerParams(
            dimension_semantics=("parallel", "parallel"),
            vmem_limit_bytes=_VMEM_LIMIT),
    )(*slabs)
    return out[:M].reshape(N, Ho, Wo, C)


def head_forward(x, model):
    """Fused AdaptiveAvgPool2d(1) + Linear(256) + ReLU + Linear(1) + ReLU."""
    N, H, W, C = x.shape
    hw = H * W
    xr = x.reshape(N, hw, C)
    Nb = _round_up(max(N, 8), 8)
    if Nb != N:
        xr = jnp.pad(xr, ((0, Nb - N), (0, 0), (0, 0)))
    w1 = model['feature_w']                       # (C_pad, 256) bf16
    b1 = model['feature_b'].reshape(1, -1)        # (1, 256) f32
    w2 = model['out_w']                           # (256, 128) bf16 (col 0 real)
    b2 = model['out_b'].reshape(1, -1)            # (1, 128) f32
    n_out = w2.shape[1]
    out = pl.pallas_call(
        functools.partial(_head_kernel, inv_hw=1.0 / float(hw)),
        out_shape=jax.ShapeDtypeStruct((Nb, n_out), jnp.float32),
        grid=(1,),
        in_specs=[
            pl.BlockSpec((Nb, hw, C), lambda i: (0, 0, 0)),
            pl.BlockSpec(w1.shape, lambda i: (0, 0)),
            pl.BlockSpec(b1.shape, lambda i: (0, 0)),
            pl.BlockSpec(w2.shape, lambda i: (0, 0)),
            pl.BlockSpec(b2.shape, lambda i: (0, 0)),
        ],
        out_specs=pl.BlockSpec((Nb, n_out), lambda i: (0, 0)),
        compiler_params=pltpu.CompilerParams(vmem_limit_bytes=_VMEM_LIMIT),
    )(xr, w1, b1, w2, b2)
    return out[:N, :1]


# ------------------------------- glue: im2col ------------------------------

def im2col(x, kh, kw, stride, padding):
    """NHWC -> (N*Ho*Wo, kh*kw*C) bf16 patches (data-movement glue)."""
    N, H, W, C = x.shape
    if padding > 0:
        x = jnp.pad(x, ((0, 0), (padding, padding), (padding, padding), (0, 0)))
    Hp, Wp = H + 2 * padding, W + 2 * padding
    Ho = (Hp - kh) // stride + 1
    Wo = (Wp - kw) // stride + 1
    cols = []
    for i in range(kh):
        for j in range(kw):
            cols.append(jax.lax.slice(
                x, (0, i, j, 0),
                (N, i + (Ho - 1) * stride + 1, j + (Wo - 1) * stride + 1, C),
                (1, stride, stride, 1)))
    patches = jnp.stack(cols, axis=3)             # (N, Ho, Wo, kh*kw, C)
    return patches.reshape(N * Ho * Wo, kh * kw * C), (N, Ho, Wo)


# -------------------------- parameter construction -------------------------

def make_conv_bn(key, cin_real, cin_pad, cout_real, kh, kw):
    cout_pad = _round_up(cout_real, _LANE)
    # Conv2d kaiming_normal_(relu): std = sqrt(2 / fan_in), fan_in = cin*kh*kw
    std = math.sqrt(2.0 / (cin_real * kh * kw))
    w = jax.random.normal(key, (kh, kw, cin_real, cout_real), jnp.float32) * std
    w_full = jnp.zeros((kh, kw, cin_pad, cout_pad), jnp.float32)
    w_full = w_full.at[:, :, :cin_real, :cout_real].set(w)
    # BN inference affine with init stats (gamma=1, beta=0, mean=0, var=1);
    # padded output channels get scale=0 so they stay exactly zero.
    scale = jnp.concatenate([
        jnp.full((cout_real,), 1.0 / math.sqrt(1.0 + _BN_EPS), jnp.float32),
        jnp.zeros((cout_pad - cout_real,), jnp.float32)])
    shift = jnp.zeros((cout_pad,), jnp.float32)
    return dict(w=w_full.reshape(kh * kw * cin_pad, cout_pad).astype(jnp.bfloat16),
                kh=kh, kw=kw, cout_real=cout_real, cout_pad=cout_pad,
                scale=scale, shift=shift)


def conv_bn(x, p, stride, padding, apply_relu, residual=None):
    N, H, W, C = x.shape
    kh, kw = p['kh'], p['kw']
    if kh == 1 and kw == 1 and padding == 0:
        xs = x if stride == 1 else jax.lax.slice(
            x, (0, 0, 0, 0), (N, H, W, C), (1, stride, stride, 1))
        _, Ho, Wo, _ = xs.shape
        patches = xs.reshape(N * Ho * Wo, C)
    else:
        patches, (N, Ho, Wo) = im2col(x, kh, kw, stride, padding)
    cout_pad = p['w'].shape[1]
    res = None if residual is None else residual.reshape(N * Ho * Wo, cout_pad)
    out = fused_matmul_bn(patches, p['w'], p['scale'], p['shift'],
                          residual=res, apply_relu=apply_relu)
    return out.reshape(N, Ho, Wo, cout_pad)


def make_bottleneck(keys, cin_real, cin_pad, planes, stride):
    cout_real = planes * 4
    conv1 = make_conv_bn(keys[0], cin_real, cin_pad, planes, 1, 1)
    conv2 = make_conv_bn(keys[1], planes, conv1['cout_pad'], planes, 3, 3)
    conv3 = make_conv_bn(keys[2], planes, conv2['cout_pad'], cout_real, 1, 1)
    unit = dict(stride=stride, conv1=conv1, conv2=conv2, conv3=conv3,
                downsample=None)
    if stride != 1 or cin_real != cout_real:
        unit['downsample'] = make_conv_bn(keys[3], cin_real, cin_pad,
                                          cout_real, 1, 1)
    return unit, cout_real, conv3['cout_pad']


def init_resnet(key, in_channels, block_params):
    keys = iter(jax.random.split(key, 256))
    model = {}
    # Conv1_Block: 7x7 s2 p3, 64 channels, BN, ReLU
    model['conv1'] = make_conv_bn(next(keys), in_channels, in_channels, 64, 7, 7)
    c_real, c_pad = 64, model['conv1']['cout_pad']
    stages = []
    for planes, n_units, stride in block_params:
        units = []
        for u in range(n_units):
            s = stride if u == 0 else 1
            unit, c_real, c_pad = make_bottleneck(
                [next(keys) for _ in range(4)], c_real, c_pad, planes, s)
            units.append(unit)
        stages.append(units)
    model['stages'] = stages
    # Linear layers, kaiming_normal_(relu), bias=0; zero rows/cols for padding.
    fw = (jax.random.normal(next(keys), (c_real, 256), jnp.float32)
          * math.sqrt(2.0 / c_real))
    model['feature_w'] = (jnp.zeros((c_pad, 256), jnp.float32)
                          .at[:c_real].set(fw).astype(jnp.bfloat16))
    model['feature_b'] = jnp.zeros((256,), jnp.float32)
    ow = (jax.random.normal(next(keys), (256, 1), jnp.float32)
          * math.sqrt(2.0 / 256))
    model['out_w'] = (jnp.zeros((256, _LANE), jnp.float32)
                      .at[:, :1].set(ow).astype(jnp.bfloat16))
    model['out_b'] = jnp.zeros((_LANE,), jnp.float32)
    return model


# --------------------------------- forward ---------------------------------

def resnet_forward(model, x_nchw):
    x = jnp.transpose(x_nchw, (0, 2, 3, 1)).astype(jnp.bfloat16)  # NCHW -> NHWC
    x = conv_bn(x, model['conv1'], stride=2, padding=3, apply_relu=True)
    x = max_pool_3x3_s2(x)
    for units in model['stages']:
        for unit in units:
            shortcut = x
            if unit['downsample'] is not None:
                shortcut = conv_bn(x, unit['downsample'], stride=unit['stride'],
                                   padding=0, apply_relu=False)
            y = conv_bn(x, unit['conv1'], stride=1, padding=0, apply_relu=True)
            y = conv_bn(y, unit['conv2'], stride=unit['stride'], padding=1,
                        apply_relu=True)
            x = conv_bn(y, unit['conv3'], stride=1, padding=0, apply_relu=True,
                        residual=shortcut)
    return head_forward(x, model)                                 # (N, 1) f32


if __name__ == "__main__":
    key = jax.random.PRNGKey(0)
    k_param, k_in = jax.random.split(key)

    input_size = (4, 16, 16)                 # (C, H, W), as in the PyTorch module
    block_params = [(8, 1, 1), (16, 1, 2)]   # (planes, num_units, stride) per stage

    model = init_resnet(k_param, input_size[0], block_params)
    x = jax.random.normal(k_in, (2,) + input_size, jnp.float32)   # NCHW input

    fwd = jax.jit(lambda inp: resnet_forward(model, inp))
    out = jax.block_until_ready(fwd(x))
    assert out.shape == (2, 1) and out.dtype == jnp.float32
    print("KERNEL_OK")
</pallas_src>

<mosaic_0001>
module attributes {stable_mosaic.version = 11 : i64} {
  func.func @_matmul_bn_kernel(%arg0: i32, %arg1: i32, %arg2: i32, %arg3: memref<128x256xbf16, #tpu.memory_space<vmem>>, %arg4: memref<256x128xbf16, #tpu.memory_space<vmem>>, %arg5: memref<1x128xf32, #tpu.memory_space<vmem>>, %arg6: memref<1x128xf32, #tpu.memory_space<vmem>>, %arg7: memref<128x128xbf16, #tpu.memory_space<vmem>>, %arg8: memref<128x128xf32, #tpu.memory_space<vmem>>) attributes {dimension_semantics = [#tpu.dimension_semantics<parallel>, #tpu.dimension_semantics<parallel>, #tpu.dimension_semantics<arbitrary>], iteration_bounds = array<i64: 1, 1, 1>, scalar_prefetch = 0 : i64, scratch_operands = 1 : i64, tpu.core_type = #tpu.core_type<tc>, window_params = [{transform_indices = @transform_0, window_bounds = array<i64: 128, 256>}, {transform_indices = @transform_1, window_bounds = array<i64: 256, 128>}, {transform_indices = @transform_2, window_bounds = array<i64: 1, 128>}, {transform_indices = @transform_3, window_bounds = array<i64: 1, 128>}, {transform_indices = @transform_4, window_bounds = array<i64: 128, 128>}]} {
    %c0_i32 = arith.constant 0 : i32
    %0 = arith.cmpi eq, %arg2, %c0_i32 : i32
    %1 = arith.extui %0 : i1 to i32
    %c0_i32_0 = arith.constant 0 : i32
    %2 = arith.cmpi ne, %1, %c0_i32_0 : i32
    scf.if %2 {
      %cst_10 = arith.constant 0.000000e+00 : f32
      %12 = vector.broadcast %cst_10 : f32 to vector<128x128xf32>
      %c0_11 = arith.constant 0 : index
      %c0_12 = arith.constant 0 : index
      %13 = vector.load %arg8[%c0_11, %c0_12] : memref<128x128xf32, #tpu.memory_space<vmem>>, vector<128x128xf32>
      tpu.vector_store %arg8[%c0_11, %c0_12], %12 {strides = array<i32>} : memref<128x128xf32, #tpu.memory_space<vmem>>, vector<128x128xf32>,
    } else {
    }
    %c0 = arith.constant 0 : index
    %c0_1 = arith.constant 0 : index
    %3 = vector.load %arg8[%c0, %c0_1] : memref<128x128xf32, #tpu.memory_space<vmem>>, vector<128x128xf32>
    %c0_2 = arith.constant 0 : index
    %c0_3 = arith.constant 0 : index
    %4 = vector.load %arg3[%c0_2, %c0_3] : memref<128x256xbf16, #tpu.memory_space<vmem>>, vector<128x256xbf16>
    %c0_4 = arith.constant 0 : index
    %c0_5 = arith.constant 0 : index
    %5 = vector.load %arg4[%c0_4, %c0_5] : memref<256x128xbf16, #tpu.memory_space<vmem>>, vector<256x128xbf16>
    %cst = arith.constant dense<0.000000e+00> : vector<128x128xf32>
    %6 = tpu.matmul %4, %5, %cst {dimension_numbers = #tpu.dot_dimension_numbers<[1], [0], [0], [1], [0, 0, 1, 1], [], []>} : vector<128x256xbf16>, vector<256x128xbf16>, vector<128x128xf32> -> vector<128x128xf32>
    %7 = arith.addf %3, %6 : vector<128x128xf32>
    %c0_6 = arith.constant 0 : index
    %c0_7 = arith.constant 0 : index
    %8 = vector.load %arg8[%c0_6, %c0_7] : memref<128x128xf32, #tpu.memory_space<vmem>>, vector<128x128xf32>
    tpu.vector_store %arg8[%c0_6, %c0_7], %7 {strides = array<i32>} : memref<128x128xf32, #tpu.memory_space<vmem>>, vector<128x128xf32>,
    %c0_i32_8 = arith.constant 0 : i32
    %9 = arith.cmpi eq, %arg2, %c0_i32_8 : i32
    %10 = arith.extui %9 : i1 to i32
    %c0_i32_9 = arith.constant 0 : i32
    %11 = arith.cmpi ne, %10, %c0_i32_9 : i32
    scf.if %11 {
      %c0_10 = arith.constant 0 : index
      %c0_11 = arith.constant 0 : index
      %12 = vector.load %arg8[%c0_10, %c0_11] : memref<128x128xf32, #tpu.memory_space<vmem>>, vector<128x128xf32>
      %c0_12 = arith.constant 0 : index
      %c0_13 = arith.constant 0 : index
      %13 = vector.load %arg5[%c0_12, %c0_13] : memref<1x128xf32, #tpu.memory_space<vmem>>, vector<1x128xf32>
      %14 = vector.broadcast %13 : vector<1x128xf32> to vector<128x128xf32>
      %15 = arith.mulf %12, %14 : vector<128x128xf32>
      %c0_14 = arith.constant 0 : index
      %c0_15 = arith.constant 0 : index
      %16 = vector.load %arg6[%c0_14, %c0_15] : memref<1x128xf32, #tpu.memory_space<vmem>>, vector<1x128xf32>
      %17 = vector.broadcast %16 : vector<1x128xf32> to vector<128x128xf32>
      %18 = arith.addf %15, %17 : vector<128x128xf32>
      %cst_16 = arith.constant 0.000000e+00 : f32
      %19 = vector.broadcast %cst_16 : f32 to vector<128x128xf32>
      %20 = arith.maximumf %18, %19 : vector<128x128xf32>
      %21 = arith.truncf %20 : vector<128x128xf32> to vector<128x128xbf16>
      %c0_17 = arith.constant 0 : index
      %c0_18 = arith.constant 0 : index
      %22 = vector.load %arg7[%c0_17, %c0_18] : memref<128x128xbf16, #tpu.memory_space<vmem>>, vector<128x128xbf16>
      tpu.vector_store %arg7[%c0_17, %c0_18], %21 {strides = array<i32>} : memref<128x128xbf16, #tpu.memory_space<vmem>>, vector<128x128xbf16>,
    } else {
    }
    return
  }
  func.func @transform_0(%arg0: i32, %arg1: i32, %arg2: i32) -> (i32, i32) {
    %c0_i32 = arith.constant 0 : i32
    return %arg0, %arg2 : i32, i32
  }
  func.func @transform_1(%arg0: i32, %arg1: i32, %arg2: i32) -> (i32, i32) {
    %c0_i32 = arith.constant 0 : i32
    return %arg2, %arg1 : i32, i32
  }
  func.func @transform_2(%arg0: i32, %arg1: i32, %arg2: i32) -> (i32, i32) {
    %c0_i32 = arith.constant 0 : i32
    %c0_i32_0 = arith.constant 0 : i32
    return %c0_i32, %arg1 : i32, i32
  }
  func.func @transform_3(%arg0: i32, %arg1: i32, %arg2: i32) -> (i32, i32) {
    %c0_i32 = arith.constant 0 : i32
    %c0_i32_0 = arith.constant 0 : i32
    return %c0_i32, %arg1 : i32, i32
  }
  func.func @transform_4(%arg0: i32, %arg1: i32, %arg2: i32) -> (i32, i32) {
    %c0_i32 = arith.constant 0 : i32
    return %arg0, %arg1 : i32, i32
  }
}

module attributes {stable_mosaic.version = 11 : i64} {
  func.func @_matmul_bn_kernel(%arg0: i32, %arg1: i32, %arg2: i32, %arg3: memref<24x128xbf16, #tpu.memory_space<vmem>>, %arg4: memref<128x128xbf16, #tpu.memory_space<vmem>>, %arg5: memref<1x128xf32, #tpu.memory_space<vmem>>, %arg6: memref<1x128xf32, #tpu.memory_space<vmem>>, %arg7: memref<24x128xbf16, #tpu.memory_space<vmem>>, %arg8: memref<24x128xf32, #tpu.memory_space<vmem>>) attributes {dimension_semantics = [#tpu.dimension_semantics<parallel>, #tpu.dimension_semantics<parallel>, #tpu.dimension_semantics<arbitrary>], iteration_bounds = array<i64: 1, 1, 1>, scalar_prefetch = 0 : i64, scratch_operands = 1 : i64, tpu.core_type = #tpu.core_type<tc>, window_params = [{transform_indices = @transform_0, window_bounds = array<i64: 24, 128>}, {transform_indices = @transform_1, window_bounds = array<i64: 128, 128>}, {transform_indices = @transform_2, window_bounds = array<i64: 1, 128>}, {transform_indices = @transform_3, window_bounds = array<i64: 1, 128>}, {transform_indices = @transform_4, window_bounds = array<i64: 24, 128>}]} {
    %c0_i32 = arith.constant 0 : i32
    %0 = arith.cmpi eq, %arg2, %c0_i32 : i32
    %1 = arith.extui %0 : i1 to i32
    %c0_i32_0 = arith.constant 0 : i32
    %2 = arith.cmpi ne, %1, %c0_i32_0 : i32
    scf.if %2 {
      %cst_10 = arith.constant 0.000000e+00 : f32
      %12 = vector.broadcast %cst_10 : f32 to vector<24x128xf32>
      %c0_11 = arith.constant 0 : index
      %c0_12 = arith.constant 0 : index
      %13 = vector.load %arg8[%c0_11, %c0_12] : memref<24x128xf32, #tpu.memory_space<vmem>>, vector<24x128xf32>
      tpu.vector_store %arg8[%c0_11, %c0_12], %12 {strides = array<i32>} : memref<24x128xf32, #tpu.memory_space<vmem>>, vector<24x128xf32>,
    } else {
    }
    %c0 = arith.constant 0 : index
    %c0_1 = arith.constant 0 : index
    %3 = vector.load %arg8[%c0, %c0_1] : memref<24x128xf32, #tpu.memory_space<vmem>>, vector<24x128xf32>
    %c0_2 = arith.constant 0 : index
    %c0_3 = arith.constant 0 : index
    %4 = vector.load %arg3[%c0_2, %c0_3] : memref<24x128xbf16, #tpu.memory_space<vmem>>, vector<24x128xbf16>
    %c0_4 = arith.constant 0 : index
    %c0_5 = arith.constant 0 : index
    %5 = vector.load %arg4[%c0_4, %c0_5] : memref<128x128xbf16, #tpu.memory_space<vmem>>, vector<128x128xbf16>
    %cst = arith.constant dense<0.000000e+00> : vector<24x128xf32>
    %6 = tpu.matmul %4, %5, %cst {dimension_numbers = #tpu.dot_dimension_numbers<[1], [0], [0], [1], [0, 0, 1, 1], [], []>} : vector<24x128xbf16>, vector<128x128xbf16>, vector<24x128xf32> -> vector<24x128xf32>
    %7 = arith.addf %3, %6 : vector<24x128xf32>
    %c0_6 = arith.constant 0 : index
    %c0_7 = arith.constant 0 : index
    %8 = vector.load %arg8[%c0_6, %c0_7] : memref<24x128xf32, #tpu.memory_space<vmem>>, vector<24x128xf32>
    tpu.vector_store %arg8[%c0_6, %c0_7], %7 {strides = array<i32>} : memref<24x128xf32, #tpu.memory_space<vmem>>, vector<24x128xf32>,
    %c0_i32_8 = arith.constant 0 : i32
    %9 = arith.cmpi eq, %arg2, %c0_i32_8 : i32
    %10 = arith.extui %9 : i1 to i32
    %c0_i32_9 = arith.constant 0 : i32
    %11 = arith.cmpi ne, %10, %c0_i32_9 : i32
    scf.if %11 {
      %c0_10 = arith.constant 0 : index
      %c0_11 = arith.constant 0 : index
      %12 = vector.load %arg8[%c0_10, %c0_11] : memref<24x128xf32, #tpu.memory_space<vmem>>, vector<24x128xf32>
      %c0_12 = arith.constant 0 : index
      %c0_13 = arith.constant 0 : index
      %13 = vector.load %arg5[%c0_12, %c0_13] : memref<1x128xf32, #tpu.memory_space<vmem>>, vector<1x128xf32>
      %14 = vector.broadcast %13 : vector<1x128xf32> to vector<24x128xf32>
      %15 = arith.mulf %12, %14 : vector<24x128xf32>
      %c0_14 = arith.constant 0 : index
      %c0_15 = arith.constant 0 : index
      %16 = vector.load %arg6[%c0_14, %c0_15] : memref<1x128xf32, #tpu.memory_space<vmem>>, vector<1x128xf32>
      %17 = vector.broadcast %16 : vector<1x128xf32> to vector<24x128xf32>
      %18 = arith.addf %15, %17 : vector<24x128xf32>
      %cst_16 = arith.constant 0.000000e+00 : f32
      %19 = vector.broadcast %cst_16 : f32 to vector<24x128xf32>
      %20 = arith.maximumf %18, %19 : vector<24x128xf32>
      %21 = arith.truncf %20 : vector<24x128xf32> to vector<24x128xbf16>
      %c0_17 = arith.constant 0 : index
      %c0_18 = arith.constant 0 : index
      %22 = vector.load %arg7[%c0_17, %c0_18] : memref<24x128xbf16, #tpu.memory_space<vmem>>, vector<24x128xbf16>
      tpu.vector_store %arg7[%c0_17, %c0_18], %21 {strides = array<i32>} : memref<24x128xbf16, #tpu.memory_space<vmem>>, vector<24x128xbf16>,
    } else {
    }
    return
  }
  func.func @transform_0(%arg0: i32, %arg1: i32, %arg2: i32) -> (i32, i32) {
    %c0_i32 = arith.constant 0 : i32
    return %arg0, %arg2 : i32, i32
  }
  func.func @transform_1(%arg0: i32, %arg1: i32, %arg2: i32) -> (i32, i32) {
    %c0_i32 = arith.constant 0 : i32
    return %arg2, %arg1 : i32, i32
  }
  func.func @transform_2(%arg0: i32, %arg1: i32, %arg2: i32) -> (i32, i32) {
    %c0_i32 = arith.constant 0 : i32
    %c0_i32_0 = arith.constant 0 : i32
    return %c0_i32, %arg1 : i32, i32
  }
  func.func @transform_3(%arg0: i32, %arg1: i32, %arg2: i32) -> (i32, i32) {
    %c0_i32 = arith.constant 0 : i32
    %c0_i32_0 = arith.constant 0 : i32
    return %c0_i32, %arg1 : i32, i32
  }
  func.func @transform_4(%arg0: i32, %arg1: i32, %arg2: i32) -> (i32, i32) {
    %c0_i32 = arith.constant 0 : i32
    return %arg0, %arg1 : i32, i32
  }
}

module attributes {stable_mosaic.version = 11 : i64} {
  func.func @_maxpool9_kernel(%arg0: i32, %arg1: i32, %arg2: memref<24x128xbf16, #tpu.memory_space<vmem>>, %arg3: memref<24x128xbf16, #tpu.memory_space<vmem>>, %arg4: memref<24x128xbf16, #tpu.memory_space<vmem>>, %arg5: memref<24x128xbf16, #tpu.memory_space<vmem>>, %arg6: memref<24x128xbf16, #tpu.memory_space<vmem>>, %arg7: memref<24x128xbf16, #tpu.memory_space<vmem>>, %arg8: memref<24x128xbf16, #tpu.memory_space<vmem>>, %arg9: memref<24x128xbf16, #tpu.memory_space<vmem>>, %arg10: memref<24x128xbf16, #tpu.memory_space<vmem>>, %arg11: memref<24x128xbf16, #tpu.memory_space<vmem>>) attributes {dimension_semantics = [#tpu.dimension_semantics<parallel>, #tpu.dimension_semantics<parallel>], iteration_bounds = array<i64: 1, 1>, scalar_prefetch = 0 : i64, scratch_operands = 0 : i64, tpu.core_type = #tpu.core_type<tc>, window_params = [{transform_indices = @transform_0, window_bounds = array<i64: 24, 128>}, {transform_indices = @transform_1, window_bounds = array<i64: 24, 128>}, {transform_indices = @transform_2, window_bounds = array<i64: 24, 128>}, {transform_indices = @transform_3, window_bounds = array<i64: 24, 128>}, {transform_indices = @transform_4, window_bounds = array<i64: 24, 128>}, {transform_indices = @transform_5, window_bounds = array<i64: 24, 128>}, {transform_indices = @transform_6, window_bounds = array<i64: 24, 128>}, {transform_indices = @transform_7, window_bounds = array<i64: 24, 128>}, {transform_indices = @transform_8, window_bounds = array<i64: 24, 128>}, {transform_indices = @transform_9, window_bounds = array<i64: 24, 128>}]} {
    %c0 = arith.constant 0 : index
    %c0_0 = arith.constant 0 : index
    %0 = vector.load %arg2[%c0, %c0_0] : memref<24x128xbf16, #tpu.memory_space<vmem>>, vector<24x128xbf16>
    %c0_1 = arith.constant 0 : index
    %c0_2 = arith.constant 0 : index
    %1 = vector.load %arg3[%c0_1, %c0_2] : memref<24x128xbf16, #tpu.memory_space<vmem>>, vector<24x128xbf16>
    %2 = arith.maximumf %0, %1 : vector<24x128xbf16>
    %c0_3 = arith.constant 0 : index
    %c0_4 = arith.constant 0 : index
    %3 = vector.load %arg4[%c0_3, %c0_4] : memref<24x128xbf16, #tpu.memory_space<vmem>>, vector<24x128xbf16>
    %c0_5 = arith.constant 0 : index
    %c0_6 = arith.constant 0 : index
    %4 = vector.load %arg5[%c0_5, %c0_6] : memref<24x128xbf16, #tpu.memory_space<vmem>>, vector<24x128xbf16>
    %5 = arith.maximumf %3, %4 : vector<24x128xbf16>
    %6 = arith.maximumf %2, %5 : vector<24x128xbf16>
    %c0_7 = arith.constant 0 : index
    %c0_8 = arith.constant 0 : index
    %7 = vector.load %arg6[%c0_7, %c0_8] : memref<24x128xbf16, #tpu.memory_space<vmem>>, vector<24x128xbf16>
    %c0_9 = arith.constant 0 : index
    %c0_10 = arith.constant 0 : index
    %8 = vector.load %arg7[%c0_9, %c0_10] : memref<24x128xbf16, #tpu.memory_space<vmem>>, vector<24x128xbf16>
    %9 = arith.maximumf %7, %8 : vector<24x128xbf16>
    %c0_11 = arith.constant 0 : index
    %c0_12 = arith.constant 0 : index
    %10 = vector.load %arg8[%c0_11, %c0_12] : memref<24x128xbf16, #tpu.memory_space<vmem>>, vector<24x128xbf16>
    %c0_13 = arith.constant 0 : index
    %c0_14 = arith.constant 0 : index
    %11 = vector.load %arg9[%c0_13, %c0_14] : memref<24x128xbf16, #tpu.memory_space<vmem>>, vector<24x128xbf16>
    %12 = arith.maximumf %10, %11 : vector<24x128xbf16>
    %13 = arith.maximumf %9, %12 : vector<24x128xbf16>
    %14 = arith.maximumf %6, %13 : vector<24x128xbf16>
    %c0_15 = arith.constant 0 : index
    %c0_16 = arith.constant 0 : index
    %15 = vector.load %arg10[%c0_15, %c0_16] : memref<24x128xbf16, #tpu.memory_space<vmem>>, vector<24x128xbf16>
    %16 = arith.maximumf %14, %15 : vector<24x128xbf16>
    %c0_17 = arith.constant 0 : index
    %c0_18 = arith.constant 0 : index
    %17 = vector.load %arg11[%c0_17, %c0_18] : memref<24x128xbf16, #tpu.memory_space<vmem>>, vector<24x128xbf16>
    tpu.vector_store %arg11[%c0_17, %c0_18], %16 {strides = array<i32>} : memref<24x128xbf16, #tpu.memory_space<vmem>>, vector<24x128xbf16>,
    return
  }
  func.func @transform_0(%arg0: i32, %arg1: i32) -> (i32, i32) {
    %c0_i32 = arith.constant 0 : i32
    return %arg0, %arg1 : i32, i32
  }
  func.func @transform_1(%arg0: i32, %arg1: i32) -> (i32, i32) {
    %c0_i32 = arith.constant 0 : i32
    return %arg0, %arg1 : i32, i32
  }
  func.func @transform_2(%arg0: i32, %arg1: i32) -> (i32, i32) {
    %c0_i32 = arith.constant 0 : i32
    return %arg0, %arg1 : i32, i32
  }
  func.func @transform_3(%arg0: i32, %arg1: i32) -> (i32, i32) {
    %c0_i32 = arith.constant 0 : i32
    return %arg0, %arg1 : i32, i32
  }
  func.func @transform_4(%arg0: i32, %arg1: i32) -> (i32, i32) {
    %c0_i32 = arith.constant 0 : i32
    return %arg0, %arg1 : i32, i32
  }
  func.func @transform_5(%arg0: i32, %arg1: i32) -> (i32, i32) {
    %c0_i32 = arith.constant 0 : i32
    return %arg0, %arg1 : i32, i32
  }
  func.func @transform_6(%arg0: i32, %arg1: i32) -> (i32, i32) {
    %c0_i32 = arith.constant 0 : i32
    return %arg0, %arg1 : i32, i32
  }
  func.func @transform_7(%arg0: i32, %arg1: i32) -> (i32, i32) {
    %c0_i32 = arith.constant 0 : i32
    return %arg0, %arg1 : i32, i32
  }
  func.func @transform_8(%arg0: i32, %arg1: i32) -> (i32, i32) {
    %c0_i32 = arith.constant 0 : i32
    return %arg0, %arg1 : i32, i32
  }
  func.func @transform_9(%arg0: i32, %arg1: i32) -> (i32, i32) {
    %c0_i32 = arith.constant 0 : i32
    return %arg0, %arg1 : i32, i32
  }
}

module attributes {stable_mosaic.version = 11 : i64} {
  func.func @_matmul_bn_kernel(%arg0: i32, %arg1: i32, %arg2: i32, %arg3: memref<24x384xbf16, #tpu.memory_space<vmem>>, %arg4: memref<384x128xbf16, #tpu.memory_space<vmem>>, %arg5: memref<1x128xf32, #tpu.memory_space<vmem>>, %arg6: memref<1x128xf32, #tpu.memory_space<vmem>>, %arg7: memref<24x128xbf16, #tpu.memory_space<vmem>>, %arg8: memref<24x128xf32, #tpu.memory_space<vmem>>) attributes {dimension_semantics = [#tpu.dimension_semantics<parallel>, #tpu.dimension_semantics<parallel>, #tpu.dimension_semantics<arbitrary>], iteration_bounds = array<i64: 1, 1, 3>, scalar_prefetch = 0 : i64, scratch_operands = 1 : i64, tpu.core_type = #tpu.core_type<tc>, window_params = [{transform_indices = @transform_0, window_bounds = array<i64: 24, 384>}, {transform_indices = @transform_1, window_bounds = array<i64: 384, 128>}, {transform_indices = @transform_2, window_bounds = array<i64: 1, 128>}, {transform_indices = @transform_3, window_bounds = array<i64: 1, 128>}, {transform_indices = @transform_4, window_bounds = array<i64: 24, 128>}]} {
    %c0_i32 = arith.constant 0 : i32
    %0 = arith.cmpi eq, %arg2, %c0_i32 : i32
    %1 = arith.extui %0 : i1 to i32
    %c0_i32_0 = arith.constant 0 : i32
    %2 = arith.cmpi ne, %1, %c0_i32_0 : i32
    scf.if %2 {
      %cst_9 = arith.constant 0.000000e+00 : f32
      %12 = vector.broadcast %cst_9 : f32 to vector<24x128xf32>
      %c0_10 = arith.constant 0 : index
      %c0_11 = arith.constant 0 : index
      %13 = vector.load %arg8[%c0_10, %c0_11] : memref<24x128xf32, #tpu.memory_space<vmem>>, vector<24x128xf32>
      tpu.vector_store %arg8[%c0_10, %c0_11], %12 {strides = array<i32>} : memref<24x128xf32, #tpu.memory_space<vmem>>, vector<24x128xf32>,
    } else {
    }
    %c0 = arith.constant 0 : index
    %c0_1 = arith.constant 0 : index
    %3 = vector.load %arg8[%c0, %c0_1] : memref<24x128xf32, #tpu.memory_space<vmem>>, vector<24x128xf32>
    %c0_2 = arith.constant 0 : index
    %c0_3 = arith.constant 0 : index
    %4 = vector.load %arg3[%c0_2, %c0_3] : memref<24x384xbf16, #tpu.memory_space<vmem>>, vector<24x384xbf16>
    %c0_4 = arith.constant 0 : index
    %c0_5 = arith.constant 0 : index
    %5 = vector.load %arg4[%c0_4, %c0_5] : memref<384x128xbf16, #tpu.memory_space<vmem>>, vector<384x128xbf16>
    %cst = arith.constant dense<0.000000e+00> : vector<24x128xf32>
    %6 = tpu.matmul %4, %5, %cst {dimension_numbers = #tpu.dot_dimension_numbers<[1], [0], [0], [1], [0, 0, 1, 1], [], []>} : vector<24x384xbf16>, vector<384x128xbf16>, vector<24x128xf32> -> vector<24x128xf32>
    %7 = arith.addf %3, %6 : vector<24x128xf32>
    %c0_6 = arith.constant 0 : index
    %c0_7 = arith.constant 0 : index
    %8 = vector.load %arg8[%c0_6, %c0_7] : memref<24x128xf32, #tpu.memory_space<vmem>>, vector<24x128xf32>
    tpu.vector_store %arg8[%c0_6, %c0_7], %7 {strides = array<i32>} : memref<24x128xf32, #tpu.memory_space<vmem>>, vector<24x128xf32>,
    %c2_i32 = arith.constant 2 : i32
    %9 = arith.cmpi eq, %arg2, %c2_i32 : i32
    %10 = arith.extui %9 : i1 to i32
    %c0_i32_8 = arith.constant 0 : i32
    %11 = arith.cmpi ne, %10, %c0_i32_8 : i32
    scf.if %11 {
      %c0_9 = arith.constant 0 : index
      %c0_10 = arith.constant 0 : index
      %12 = vector.load %arg8[%c0_9, %c0_10] : memref<24x128xf32, #tpu.memory_space<vmem>>, vector<24x128xf32>
      %c0_11 = arith.constant 0 : index
      %c0_12 = arith.constant 0 : index
      %13 = vector.load %arg5[%c0_11, %c0_12] : memref<1x128xf32, #tpu.memory_space<vmem>>, vector<1x128xf32>
      %14 = vector.broadcast %13 : vector<1x128xf32> to vector<24x128xf32>
      %15 = arith.mulf %12, %14 : vector<24x128xf32>
      %c0_13 = arith.constant 0 : index
      %c0_14 = arith.constant 0 : index
      %16 = vector.load %arg6[%c0_13, %c0_14] : memref<1x128xf32, #tpu.memory_space<vmem>>, vector<1x128xf32>
      %17 = vector.broadcast %16 : vector<1x128xf32> to vector<24x128xf32>
      %18 = arith.addf %15, %17 : vector<24x128xf32>
      %cst_15 = arith.constant 0.000000e+00 : f32
      %19 = vector.broadcast %cst_15 : f32 to vector<24x128xf32>
      %20 = arith.maximumf %18, %19 : vector<24x128xf32>
      %21 = arith.truncf %20 : vector<24x128xf32> to vector<24x128xbf16>
      %c0_16 = arith.constant 0 : index
      %c0_17 = arith.constant 0 : index
      %22 = vector.load %arg7[%c0_16, %c0_17] : memref<24x128xbf16, #tpu.memory_space<vmem>>, vector<24x128xbf16>
      tpu.vector_store %arg7[%c0_16, %c0_17], %21 {strides = array<i32>} : memref<24x128xbf16, #tpu.memory_space<vmem>>, vector<24x128xbf16>,
    } else {
    }
    return
  }
  func.func @transform_0(%arg0: i32, %arg1: i32, %arg2: i32) -> (i32, i32) {
    %c0_i32 = arith.constant 0 : i32
    return %arg0, %arg2 : i32, i32
  }
  func.func @transform_1(%arg0: i32, %arg1: i32, %arg2: i32) -> (i32, i32) {
    %c0_i32 = arith.constant 0 : i32
    return %arg2, %arg1 : i32, i32
  }
  func.func @transform_2(%arg0: i32, %arg1: i32, %arg2: i32) -> (i32, i32) {
    %c0_i32 = arith.constant 0 : i32
    %c0_i32_0 = arith.constant 0 : i32
    return %c0_i32, %arg1 : i32, i32
  }
  func.func @transform_3(%arg0: i32, %arg1: i32, %arg2: i32) -> (i32, i32) {
    %c0_i32 = arith.constant 0 : i32
    %c0_i32_0 = arith.constant 0 : i32
    return %c0_i32, %arg1 : i32, i32
  }
  func.func @transform_4(%arg0: i32, %arg1: i32, %arg2: i32) -> (i32, i32) {
    %c0_i32 = arith.constant 0 : i32
    return %arg0, %arg1 : i32, i32
  }
}

module attributes {stable_mosaic.version = 11 : i64} {
  func.func @_matmul_bn_kernel(%arg0: i32, %arg1: i32, %arg2: i32, %arg3: memref<24x128xbf16, #tpu.memory_space<vmem>>, %arg4: memref<128x128xbf16, #tpu.memory_space<vmem>>, %arg5: memref<1x128xf32, #tpu.memory_space<vmem>>, %arg6: memref<1x128xf32, #tpu.memory_space<vmem>>, %arg7: memref<24x128xbf16, #tpu.memory_space<vmem>>, %arg8: memref<24x128xf32, #tpu.memory_space<vmem>>) attributes {dimension_semantics = [#tpu.dimension_semantics<parallel>, #tpu.dimension_semantics<parallel>, #tpu.dimension_semantics<arbitrary>], iteration_bounds = array<i64: 1, 1, 1>, scalar_prefetch = 0 : i64, scratch_operands = 1 : i64, tpu.core_type = #tpu.core_type<tc>, window_params = [{transform_indices = @transform_0, window_bounds = array<i64: 24, 128>}, {transform_indices = @transform_1, window_bounds = array<i64: 128, 128>}, {transform_indices = @transform_2, window_bounds = array<i64: 1, 128>}, {transform_indices = @transform_3, window_bounds = array<i64: 1, 128>}, {transform_indices = @transform_4, window_bounds = array<i64: 24, 128>}]} {
    %c0_i32 = arith.constant 0 : i32
    %0 = arith.cmpi eq, %arg2, %c0_i32 : i32
    %1 = arith.extui %0 : i1 to i32
    %c0_i32_0 = arith.constant 0 : i32
    %2 = arith.cmpi ne, %1, %c0_i32_0 : i32
    scf.if %2 {
      %cst_10 = arith.constant 0.000000e+00 : f32
      %12 = vector.broadcast %cst_10 : f32 to vector<24x128xf32>
      %c0_11 = arith.constant 0 : index
      %c0_12 = arith.constant 0 : index
      %13 = vector.load %arg8[%c0_11, %c0_12] : memref<24x128xf32, #tpu.memory_space<vmem>>, vector<24x128xf32>
      tpu.vector_store %arg8[%c0_11, %c0_12], %12 {strides = array<i32>} : memref<24x128xf32, #tpu.memory_space<vmem>>, vector<24x128xf32>,
    } else {
    }
    %c0 = arith.constant 0 : index
    %c0_1 = arith.constant 0 : index
    %3 = vector.load %arg8[%c0, %c0_1] : memref<24x128xf32, #tpu.memory_space<vmem>>, vector<24x128xf32>
    %c0_2 = arith.constant 0 : index
    %c0_3 = arith.constant 0 : index
    %4 = vector.load %arg3[%c0_2, %c0_3] : memref<24x128xbf16, #tpu.memory_space<vmem>>, vector<24x128xbf16>
    %c0_4 = arith.constant 0 : index
    %c0_5 = arith.constant 0 : index
    %5 = vector.load %arg4[%c0_4, %c0_5] : memref<128x128xbf16, #tpu.memory_space<vmem>>, vector<128x128xbf16>
    %cst = arith.constant dense<0.000000e+00> : vector<24x128xf32>
    %6 = tpu.matmul %4, %5, %cst {dimension_numbers = #tpu.dot_dimension_numbers<[1], [0], [0], [1], [0, 0, 1, 1], [], []>} : vector<24x128xbf16>, vector<128x128xbf16>, vector<24x128xf32> -> vector<24x128xf32>
    %7 = arith.addf %3, %6 : vector<24x128xf32>
    %c0_6 = arith.constant 0 : index
    %c0_7 = arith.constant 0 : index
    %8 = vector.load %arg8[%c0_6, %c0_7] : memref<24x128xf32, #tpu.memory_space<vmem>>, vector<24x128xf32>
    tpu.vector_store %arg8[%c0_6, %c0_7], %7 {strides = array<i32>} : memref<24x128xf32, #tpu.memory_space<vmem>>, vector<24x128xf32>,
    %c0_i32_8 = arith.constant 0 : i32
    %9 = arith.cmpi eq, %arg2, %c0_i32_8 : i32
    %10 = arith.extui %9 : i1 to i32
    %c0_i32_9 = arith.constant 0 : i32
    %11 = arith.cmpi ne, %10, %c0_i32_9 : i32
    scf.if %11 {
      %c0_10 = arith.constant 0 : index
      %c0_11 = arith.constant 0 : index
      %12 = vector.load %arg8[%c0_10, %c0_11] : memref<24x128xf32, #tpu.memory_space<vmem>>, vector<24x128xf32>
      %c0_12 = arith.constant 0 : index
      %c0_13 = arith.constant 0 : index
      %13 = vector.load %arg5[%c0_12, %c0_13] : memref<1x128xf32, #tpu.memory_space<vmem>>, vector<1x128xf32>
      %14 = vector.broadcast %13 : vector<1x128xf32> to vector<24x128xf32>
      %15 = arith.mulf %12, %14 : vector<24x128xf32>
      %c0_14 = arith.constant 0 : index
      %c0_15 = arith.constant 0 : index
      %16 = vector.load %arg6[%c0_14, %c0_15] : memref<1x128xf32, #tpu.memory_space<vmem>>, vector<1x128xf32>
      %17 = vector.broadcast %16 : vector<1x128xf32> to vector<24x128xf32>
      %18 = arith.addf %15, %17 : vector<24x128xf32>
      %19 = arith.truncf %18 : vector<24x128xf32> to vector<24x128xbf16>
      %c0_16 = arith.constant 0 : index
      %c0_17 = arith.constant 0 : index
      %20 = vector.load %arg7[%c0_16, %c0_17] : memref<24x128xbf16, #tpu.memory_space<vmem>>, vector<24x128xbf16>
      tpu.vector_store %arg7[%c0_16, %c0_17], %19 {strides = array<i32>} : memref<24x128xbf16, #tpu.memory_space<vmem>>, vector<24x128xbf16>,
    } else {
    }
    return
  }
  func.func @transform_0(%arg0: i32, %arg1: i32, %arg2: i32) -> (i32, i32) {
    %c0_i32 = arith.constant 0 : i32
    return %arg0, %arg2 : i32, i32
  }
  func.func @transform_1(%arg0: i32, %arg1: i32, %arg2: i32) -> (i32, i32) {
    %c0_i32 = arith.constant 0 : i32
    return %arg2, %arg1 : i32, i32
  }
  func.func @transform_2(%arg0: i32, %arg1: i32, %arg2: i32) -> (i32, i32) {
    %c0_i32 = arith.constant 0 : i32
    %c0_i32_0 = arith.constant 0 : i32
    return %c0_i32, %arg1 : i32, i32
  }
  func.func @transform_3(%arg0: i32, %arg1: i32, %arg2: i32) -> (i32, i32) {
    %c0_i32 = arith.constant 0 : i32
    %c0_i32_0 = arith.constant 0 : i32
    return %c0_i32, %arg1 : i32, i32
  }
  func.func @transform_4(%arg0: i32, %arg1: i32, %arg2: i32) -> (i32, i32) {
    %c0_i32 = arith.constant 0 : i32
    return %arg0, %arg1 : i32, i32
  }
}

module attributes {stable_mosaic.version = 11 : i64} {
  func.func @_matmul_bn_res_kernel(%arg0: i32, %arg1: i32, %arg2: i32, %arg3: memref<24x128xbf16, #tpu.memory_space<vmem>>, %arg4: memref<128x128xbf16, #tpu.memory_space<vmem>>, %arg5: memref<1x128xf32, #tpu.memory_space<vmem>>, %arg6: memref<1x128xf32, #tpu.memory_space<vmem>>, %arg7: memref<24x128xbf16, #tpu.memory_space<vmem>>, %arg8: memref<24x128xbf16, #tpu.memory_space<vmem>>, %arg9: memref<24x128xf32, #tpu.memory_space<vmem>>) attributes {dimension_semantics = [#tpu.dimension_semantics<parallel>, #tpu.dimension_semantics<parallel>, #tpu.dimension_semantics<arbitrary>], iteration_bounds = array<i64: 1, 1, 1>, scalar_prefetch = 0 : i64, scratch_operands = 1 : i64, tpu.core_type = #tpu.core_type<tc>, window_params = [{transform_indices = @transform_0, window_bounds = array<i64: 24, 128>}, {transform_indices = @transform_1, window_bounds = array<i64: 128, 128>}, {transform_indices = @transform_2, window_bounds = array<i64: 1, 128>}, {transform_indices = @transform_3, window_bounds = array<i64: 1, 128>}, {transform_indices = @transform_4, window_bounds = array<i64: 24, 128>}, {transform_indices = @transform_5, window_bounds = array<i64: 24, 128>}]} {
    %c0_i32 = arith.constant 0 : i32
    %0 = arith.cmpi eq, %arg2, %c0_i32 : i32
    %1 = arith.extui %0 : i1 to i32
    %c0_i32_0 = arith.constant 0 : i32
    %2 = arith.cmpi ne, %1, %c0_i32_0 : i32
    scf.if %2 {
      %cst_10 = arith.constant 0.000000e+00 : f32
      %12 = vector.broadcast %cst_10 : f32 to vector<24x128xf32>
      %c0_11 = arith.constant 0 : index
      %c0_12 = arith.constant 0 : index
      %13 = vector.load %arg9[%c0_11, %c0_12] : memref<24x128xf32, #tpu.memory_space<vmem>>, vector<24x128xf32>
      tpu.vector_store %arg9[%c0_11, %c0_12], %12 {strides = array<i32>} : memref<24x128xf32, #tpu.memory_space<vmem>>, vector<24x128xf32>,
    } else {
    }
    %c0 = arith.constant 0 : index
    %c0_1 = arith.constant 0 : index
    %3 = vector.load %arg9[%c0, %c0_1] : memref<24x128xf32, #tpu.memory_space<vmem>>, vector<24x128xf32>
    %c0_2 = arith.constant 0 : index
    %c0_3 = arith.constant 0 : index
    %4 = vector.load %arg3[%c0_2, %c0_3] : memref<24x128xbf16, #tpu.memory_space<vmem>>, vector<24x128xbf16>
    %c0_4 = arith.constant 0 : index
    %c0_5 = arith.constant 0 : index
    %5 = vector.load %arg4[%c0_4, %c0_5] : memref<128x128xbf16, #tpu.memory_space<vmem>>, vector<128x128xbf16>
    %cst = arith.constant dense<0.000000e+00> : vector<24x128xf32>
    %6 = tpu.matmul %4, %5, %cst {dimension_numbers = #tpu.dot_dimension_numbers<[1], [0], [0], [1], [0, 0, 1, 1], [], []>} : vector<24x128xbf16>, vector<128x128xbf16>, vector<24x128xf32> -> vector<24x128xf32>
    %7 = arith.addf %3, %6 : vector<24x128xf32>
    %c0_6 = arith.constant 0 : index
    %c0_7 = arith.constant 0 : index
    %8 = vector.load %arg9[%c0_6, %c0_7] : memref<24x128xf32, #tpu.memory_space<vmem>>, vector<24x128xf32>
    tpu.vector_store %arg9[%c0_6, %c0_7], %7 {strides = array<i32>} : memref<24x128xf32, #tpu.memory_space<vmem>>, vector<24x128xf32>,
    %c0_i32_8 = arith.constant 0 : i32
    %9 = arith.cmpi eq, %arg2, %c0_i32_8 : i32
    %10 = arith.extui %9 : i1 to i32
    %c0_i32_9 = arith.constant 0 : i32
    %11 = arith.cmpi ne, %10, %c0_i32_9 : i32
    scf.if %11 {
      %c0_10 = arith.constant 0 : index
      %c0_11 = arith.constant 0 : index
      %12 = vector.load %arg9[%c0_10, %c0_11] : memref<24x128xf32, #tpu.memory_space<vmem>>, vector<24x128xf32>
      %c0_12 = arith.constant 0 : index
      %c0_13 = arith.constant 0 : index
      %13 = vector.load %arg5[%c0_12, %c0_13] : memref<1x128xf32, #tpu.memory_space<vmem>>, vector<1x128xf32>
      %14 = vector.broadcast %13 : vector<1x128xf32> to vector<24x128xf32>
      %15 = arith.mulf %12, %14 : vector<24x128xf32>
      %c0_14 = arith.constant 0 : index
      %c0_15 = arith.constant 0 : index
      %16 = vector.load %arg6[%c0_14, %c0_15] : memref<1x128xf32, #tpu.memory_space<vmem>>, vector<1x128xf32>
      %17 = vector.broadcast %16 : vector<1x128xf32> to vector<24x128xf32>
      %18 = arith.addf %15, %17 : vector<24x128xf32>
      %c0_16 = arith.constant 0 : index
      %c0_17 = arith.constant 0 : index
      %19 = vector.load %arg7[%c0_16, %c0_17] : memref<24x128xbf16, #tpu.memory_space<vmem>>, vector<24x128xbf16>
      %20 = arith.extf %19 : vector<24x128xbf16> to vector<24x128xf32>
      %21 = arith.addf %18, %20 : vector<24x128xf32>
      %cst_18 = arith.constant 0.000000e+00 : f32
      %22 = vector.broadcast %cst_18 : f32 to vector<24x128xf32>
      %23 = arith.maximumf %21, %22 : vector<24x128xf32>
      %24 = arith.truncf %23 : vector<24x128xf32> to vector<24x128xbf16>
      %c0_19 = arith.constant 0 : index
      %c0_20 = arith.constant 0 : index
      %25 = vector.load %arg8[%c0_19, %c0_20] : memref<24x128xbf16, #tpu.memory_space<vmem>>, vector<24x128xbf16>
      tpu.vector_store %arg8[%c0_19, %c0_20], %24 {strides = array<i32>} : memref<24x128xbf16, #tpu.memory_space<vmem>>, vector<24x128xbf16>,
    } else {
    }
    return
  }
  func.func @transform_0(%arg0: i32, %arg1: i32, %arg2: i32) -> (i32, i32) {
    %c0_i32 = arith.constant 0 : i32
    return %arg0, %arg2 : i32, i32
  }
  func.func @transform_1(%arg0: i32, %arg1: i32, %arg2: i32) -> (i32, i32) {
    %c0_i32 = arith.constant 0 : i32
    return %arg2, %arg1 : i32, i32
  }
  func.func @transform_2(%arg0: i32, %arg1: i32, %arg2: i32) -> (i32, i32) {
    %c0_i32 = arith.constant 0 : i32
    %c0_i32_0 = arith.constant 0 : i32
    return %c0_i32, %arg1 : i32, i32
  }
  func.func @transform_3(%arg0: i32, %arg1: i32, %arg2: i32) -> (i32, i32) {
    %c0_i32 = arith.constant 0 : i32
    %c0_i32_0 = arith.constant 0 : i32
    return %c0_i32, %arg1 : i32, i32
  }
  func.func @transform_4(%arg0: i32, %arg1: i32, %arg2: i32) -> (i32, i32) {
    %c0_i32 = arith.constant 0 : i32
    return %arg0, %arg1 : i32, i32
  }
  func.func @transform_5(%arg0: i32, %arg1: i32, %arg2: i32) -> (i32, i32) {
    %c0_i32 = arith.constant 0 : i32
    return %arg0, %arg1 : i32, i32
  }
}

module attributes {stable_mosaic.version = 11 : i64} {
  func.func @_matmul_bn_kernel(%arg0: i32, %arg1: i32, %arg2: i32, %arg3: memref<8x384xbf16, #tpu.memory_space<vmem>>, %arg4: memref<384x128xbf16, #tpu.memory_space<vmem>>, %arg5: memref<1x128xf32, #tpu.memory_space<vmem>>, %arg6: memref<1x128xf32, #tpu.memory_space<vmem>>, %arg7: memref<8x128xbf16, #tpu.memory_space<vmem>>, %arg8: memref<8x128xf32, #tpu.memory_space<vmem>>) attributes {dimension_semantics = [#tpu.dimension_semantics<parallel>, #tpu.dimension_semantics<parallel>, #tpu.dimension_semantics<arbitrary>], iteration_bounds = array<i64: 1, 1, 3>, scalar_prefetch = 0 : i64, scratch_operands = 1 : i64, tpu.core_type = #tpu.core_type<tc>, window_params = [{transform_indices = @transform_0, window_bounds = array<i64: 8, 384>}, {transform_indices = @transform_1, window_bounds = array<i64: 384, 128>}, {transform_indices = @transform_2, window_bounds = array<i64: 1, 128>}, {transform_indices = @transform_3, window_bounds = array<i64: 1, 128>}, {transform_indices = @transform_4, window_bounds = array<i64: 8, 128>}]} {
    %c0_i32 = arith.constant 0 : i32
    %0 = arith.cmpi eq, %arg2, %c0_i32 : i32
    %1 = arith.extui %0 : i1 to i32
    %c0_i32_0 = arith.constant 0 : i32
    %2 = arith.cmpi ne, %1, %c0_i32_0 : i32
    scf.if %2 {
      %cst_9 = arith.constant 0.000000e+00 : f32
      %12 = vector.broadcast %cst_9 : f32 to vector<8x128xf32>
      %c0_10 = arith.constant 0 : index
      %c0_11 = arith.constant 0 : index
      %13 = vector.load %arg8[%c0_10, %c0_11] : memref<8x128xf32, #tpu.memory_space<vmem>>, vector<8x128xf32>
      tpu.vector_store %arg8[%c0_10, %c0_11], %12 {strides = array<i32>} : memref<8x128xf32, #tpu.memory_space<vmem>>, vector<8x128xf32>,
    } else {
    }
    %c0 = arith.constant 0 : index
    %c0_1 = arith.constant 0 : index
    %3 = vector.load %arg8[%c0, %c0_1] : memref<8x128xf32, #tpu.memory_space<vmem>>, vector<8x128xf32>
    %c0_2 = arith.constant 0 : index
    %c0_3 = arith.constant 0 : index
    %4 = vector.load %arg3[%c0_2, %c0_3] : memref<8x384xbf16, #tpu.memory_space<vmem>>, vector<8x384xbf16>
    %c0_4 = arith.constant 0 : index
    %c0_5 = arith.constant 0 : index
    %5 = vector.load %arg4[%c0_4, %c0_5] : memref<384x128xbf16, #tpu.memory_space<vmem>>, vector<384x128xbf16>
    %cst = arith.constant dense<0.000000e+00> : vector<8x128xf32>
    %6 = tpu.matmul %4, %5, %cst {dimension_numbers = #tpu.dot_dimension_numbers<[1], [0], [0], [1], [0, 0, 1, 1], [], []>} : vector<8x384xbf16>, vector<384x128xbf16>, vector<8x128xf32> -> vector<8x128xf32>
    %7 = arith.addf %3, %6 : vector<8x128xf32>
    %c0_6 = arith.constant 0 : index
    %c0_7 = arith.constant 0 : index
    %8 = vector.load %arg8[%c0_6, %c0_7] : memref<8x128xf32, #tpu.memory_space<vmem>>, vector<8x128xf32>
    tpu.vector_store %arg8[%c0_6, %c0_7], %7 {strides = array<i32>} : memref<8x128xf32, #tpu.memory_space<vmem>>, vector<8x128xf32>,
    %c2_i32 = arith.constant 2 : i32
    %9 = arith.cmpi eq, %arg2, %c2_i32 : i32
    %10 = arith.extui %9 : i1 to i32
    %c0_i32_8 = arith.constant 0 : i32
    %11 = arith.cmpi ne, %10, %c0_i32_8 : i32
    scf.if %11 {
      %c0_9 = arith.constant 0 : index
      %c0_10 = arith.constant 0 : index
      %12 = vector.load %arg8[%c0_9, %c0_10] : memref<8x128xf32, #tpu.memory_space<vmem>>, vector<8x128xf32>
      %c0_11 = arith.constant 0 : index
      %c0_12 = arith.constant 0 : index
      %13 = vector.load %arg5[%c0_11, %c0_12] : memref<1x128xf32, #tpu.memory_space<vmem>>, vector<1x128xf32>
      %14 = vector.broadcast %13 : vector<1x128xf32> to vector<8x128xf32>
      %15 = arith.mulf %12, %14 : vector<8x128xf32>
      %c0_13 = arith.constant 0 : index
      %c0_14 = arith.constant 0 : index
      %16 = vector.load %arg6[%c0_13, %c0_14] : memref<1x128xf32, #tpu.memory_space<vmem>>, vector<1x128xf32>
      %17 = vector.broadcast %16 : vector<1x128xf32> to vector<8x128xf32>
      %18 = arith.addf %15, %17 : vector<8x128xf32>
      %cst_15 = arith.constant 0.000000e+00 : f32
      %19 = vector.broadcast %cst_15 : f32 to vector<8x128xf32>
      %20 = arith.maximumf %18, %19 : vector<8x128xf32>
      %21 = arith.truncf %20 : vector<8x128xf32> to vector<8x128xbf16>
      %c0_16 = arith.constant 0 : index
      %c0_17 = arith.constant 0 : index
      %22 = vector.load %arg7[%c0_16, %c0_17] : memref<8x128xbf16, #tpu.memory_space<vmem>>, vector<8x128xbf16>
      tpu.vector_store %arg7[%c0_16, %c0_17], %21 {strides = array<i32>} : memref<8x128xbf16, #tpu.memory_space<vmem>>, vector<8x128xbf16>,
    } else {
    }
    return
  }
  func.func @transform_0(%arg0: i32, %arg1: i32, %arg2: i32) -> (i32, i32) {
    %c0_i32 = arith.constant 0 : i32
    return %arg0, %arg2 : i32, i32
  }
  func.func @transform_1(%arg0: i32, %arg1: i32, %arg2: i32) -> (i32, i32) {
    %c0_i32 = arith.constant 0 : i32
    return %arg2, %arg1 : i32, i32
  }
  func.func @transform_2(%arg0: i32, %arg1: i32, %arg2: i32) -> (i32, i32) {
    %c0_i32 = arith.constant 0 : i32
    %c0_i32_0 = arith.constant 0 : i32
    return %c0_i32, %arg1 : i32, i32
  }
  func.func @transform_3(%arg0: i32, %arg1: i32, %arg2: i32) -> (i32, i32) {
    %c0_i32 = arith.constant 0 : i32
    %c0_i32_0 = arith.constant 0 : i32
    return %c0_i32, %arg1 : i32, i32
  }
  func.func @transform_4(%arg0: i32, %arg1: i32, %arg2: i32) -> (i32, i32) {
    %c0_i32 = arith.constant 0 : i32
    return %arg0, %arg1 : i32, i32
  }
}

module attributes {stable_mosaic.version = 11 : i64} {
  func.func @_matmul_bn_kernel(%arg0: i32, %arg1: i32, %arg2: i32, %arg3: memref<8x128xbf16, #tpu.memory_space<vmem>>, %arg4: memref<128x128xbf16, #tpu.memory_space<vmem>>, %arg5: memref<1x128xf32, #tpu.memory_space<vmem>>, %arg6: memref<1x128xf32, #tpu.memory_space<vmem>>, %arg7: memref<8x128xbf16, #tpu.memory_space<vmem>>, %arg8: memref<8x128xf32, #tpu.memory_space<vmem>>) attributes {dimension_semantics = [#tpu.dimension_semantics<parallel>, #tpu.dimension_semantics<parallel>, #tpu.dimension_semantics<arbitrary>], iteration_bounds = array<i64: 1, 1, 1>, scalar_prefetch = 0 : i64, scratch_operands = 1 : i64, tpu.core_type = #tpu.core_type<tc>, window_params = [{transform_indices = @transform_0, window_bounds = array<i64: 8, 128>}, {transform_indices = @transform_1, window_bounds = array<i64: 128, 128>}, {transform_indices = @transform_2, window_bounds = array<i64: 1, 128>}, {transform_indices = @transform_3, window_bounds = array<i64: 1, 128>}, {transform_indices = @transform_4, window_bounds = array<i64: 8, 128>}]} {
    %c0_i32 = arith.constant 0 : i32
    %0 = arith.cmpi eq, %arg2, %c0_i32 : i32
    %1 = arith.extui %0 : i1 to i32
    %c0_i32_0 = arith.constant 0 : i32
    %2 = arith.cmpi ne, %1, %c0_i32_0 : i32
    scf.if %2 {
      %cst_10 = arith.constant 0.000000e+00 : f32
      %12 = vector.broadcast %cst_10 : f32 to vector<8x128xf32>
      %c0_11 = arith.constant 0 : index
      %c0_12 = arith.constant 0 : index
      %13 = vector.load %arg8[%c0_11, %c0_12] : memref<8x128xf32, #tpu.memory_space<vmem>>, vector<8x128xf32>
      tpu.vector_store %arg8[%c0_11, %c0_12], %12 {strides = array<i32>} : memref<8x128xf32, #tpu.memory_space<vmem>>, vector<8x128xf32>,
    } else {
    }
    %c0 = arith.constant 0 : index
    %c0_1 = arith.constant 0 : index
    %3 = vector.load %arg8[%c0, %c0_1] : memref<8x128xf32, #tpu.memory_space<vmem>>, vector<8x128xf32>
    %c0_2 = arith.constant 0 : index
    %c0_3 = arith.constant 0 : index
    %4 = vector.load %arg3[%c0_2, %c0_3] : memref<8x128xbf16, #tpu.memory_space<vmem>>, vector<8x128xbf16>
    %c0_4 = arith.constant 0 : index
    %c0_5 = arith.constant 0 : index
    %5 = vector.load %arg4[%c0_4, %c0_5] : memref<128x128xbf16, #tpu.memory_space<vmem>>, vector<128x128xbf16>
    %cst = arith.constant dense<0.000000e+00> : vector<8x128xf32>
    %6 = tpu.matmul %4, %5, %cst {dimension_numbers = #tpu.dot_dimension_numbers<[1], [0], [0], [1], [0, 0, 1, 1], [], []>} : vector<8x128xbf16>, vector<128x128xbf16>, vector<8x128xf32> -> vector<8x128xf32>
    %7 = arith.addf %3, %6 : vector<8x128xf32>
    %c0_6 = arith.constant 0 : index
    %c0_7 = arith.constant 0 : index
    %8 = vector.load %arg8[%c0_6, %c0_7] : memref<8x128xf32, #tpu.memory_space<vmem>>, vector<8x128xf32>
    tpu.vector_store %arg8[%c0_6, %c0_7], %7 {strides = array<i32>} : memref<8x128xf32, #tpu.memory_space<vmem>>, vector<8x128xf32>,
    %c0_i32_8 = arith.constant 0 : i32
    %9 = arith.cmpi eq, %arg2, %c0_i32_8 : i32
    %10 = arith.extui %9 : i1 to i32
    %c0_i32_9 = arith.constant 0 : i32
    %11 = arith.cmpi ne, %10, %c0_i32_9 : i32
    scf.if %11 {
      %c0_10 = arith.constant 0 : index
      %c0_11 = arith.constant 0 : index
      %12 = vector.load %arg8[%c0_10, %c0_11] : memref<8x128xf32, #tpu.memory_space<vmem>>, vector<8x128xf32>
      %c0_12 = arith.constant 0 : index
      %c0_13 = arith.constant 0 : index
      %13 = vector.load %arg5[%c0_12, %c0_13] : memref<1x128xf32, #tpu.memory_space<vmem>>, vector<1x128xf32>
      %14 = vector.broadcast %13 : vector<1x128xf32> to vector<8x128xf32>
      %15 = arith.mulf %12, %14 : vector<8x128xf32>
      %c0_14 = arith.constant 0 : index
      %c0_15 = arith.constant 0 : index
      %16 = vector.load %arg6[%c0_14, %c0_15] : memref<1x128xf32, #tpu.memory_space<vmem>>, vector<1x128xf32>
      %17 = vector.broadcast %16 : vector<1x128xf32> to vector<8x128xf32>
      %18 = arith.addf %15, %17 : vector<8x128xf32>
      %19 = arith.truncf %18 : vector<8x128xf32> to vector<8x128xbf16>
      %c0_16 = arith.constant 0 : index
      %c0_17 = arith.constant 0 : index
      %20 = vector.load %arg7[%c0_16, %c0_17] : memref<8x128xbf16, #tpu.memory_space<vmem>>, vector<8x128xbf16>
      tpu.vector_store %arg7[%c0_16, %c0_17], %19 {strides = array<i32>} : memref<8x128xbf16, #tpu.memory_space<vmem>>, vector<8x128xbf16>,
    } else {
    }
    return
  }
  func.func @transform_0(%arg0: i32, %arg1: i32, %arg2: i32) -> (i32, i32) {
    %c0_i32 = arith.constant 0 : i32
    return %arg0, %arg2 : i32, i32
  }
  func.func @transform_1(%arg0: i32, %arg1: i32, %arg2: i32) -> (i32, i32) {
    %c0_i32 = arith.constant 0 : i32
    return %arg2, %arg1 : i32, i32
  }
  func.func @transform_2(%arg0: i32, %arg1: i32, %arg2: i32) -> (i32, i32) {
    %c0_i32 = arith.constant 0 : i32
    %c0_i32_0 = arith.constant 0 : i32
    return %c0_i32, %arg1 : i32, i32
  }
  func.func @transform_3(%arg0: i32, %arg1: i32, %arg2: i32) -> (i32, i32) {
    %c0_i32 = arith.constant 0 : i32
    %c0_i32_0 = arith.constant 0 : i32
    return %c0_i32, %arg1 : i32, i32
  }
  func.func @transform_4(%arg0: i32, %arg1: i32, %arg2: i32) -> (i32, i32) {
    %c0_i32 = arith.constant 0 : i32
    return %arg0, %arg1 : i32, i32
  }
}

module attributes {stable_mosaic.version = 11 : i64} {
  func.func @_matmul_bn_res_kernel(%arg0: i32, %arg1: i32, %arg2: i32, %arg3: memref<8x128xbf16, #tpu.memory_space<vmem>>, %arg4: memref<128x128xbf16, #tpu.memory_space<vmem>>, %arg5: memref<1x128xf32, #tpu.memory_space<vmem>>, %arg6: memref<1x128xf32, #tpu.memory_space<vmem>>, %arg7: memref<8x128xbf16, #tpu.memory_space<vmem>>, %arg8: memref<8x128xbf16, #tpu.memory_space<vmem>>, %arg9: memref<8x128xf32, #tpu.memory_space<vmem>>) attributes {dimension_semantics = [#tpu.dimension_semantics<parallel>, #tpu.dimension_semantics<parallel>, #tpu.dimension_semantics<arbitrary>], iteration_bounds = array<i64: 1, 1, 1>, scalar_prefetch = 0 : i64, scratch_operands = 1 : i64, tpu.core_type = #tpu.core_type<tc>, window_params = [{transform_indices = @transform_0, window_bounds = array<i64: 8, 128>}, {transform_indices = @transform_1, window_bounds = array<i64: 128, 128>}, {transform_indices = @transform_2, window_bounds = array<i64: 1, 128>}, {transform_indices = @transform_3, window_bounds = array<i64: 1, 128>}, {transform_indices = @transform_4, window_bounds = array<i64: 8, 128>}, {transform_indices = @transform_5, window_bounds = array<i64: 8, 128>}]} {
    %c0_i32 = arith.constant 0 : i32
    %0 = arith.cmpi eq, %arg2, %c0_i32 : i32
    %1 = arith.extui %0 : i1 to i32
    %c0_i32_0 = arith.constant 0 : i32
    %2 = arith.cmpi ne, %1, %c0_i32_0 : i32
    scf.if %2 {
      %cst_10 = arith.constant 0.000000e+00 : f32
      %12 = vector.broadcast %cst_10 : f32 to vector<8x128xf32>
      %c0_11 = arith.constant 0 : index
      %c0_12 = arith.constant 0 : index
      %13 = vector.load %arg9[%c0_11, %c0_12] : memref<8x128xf32, #tpu.memory_space<vmem>>, vector<8x128xf32>
      tpu.vector_store %arg9[%c0_11, %c0_12], %12 {strides = array<i32>} : memref<8x128xf32, #tpu.memory_space<vmem>>, vector<8x128xf32>,
    } else {
    }
    %c0 = arith.constant 0 : index
    %c0_1 = arith.constant 0 : index
    %3 = vector.load %arg9[%c0, %c0_1] : memref<8x128xf32, #tpu.memory_space<vmem>>, vector<8x128xf32>
    %c0_2 = arith.constant 0 : index
    %c0_3 = arith.constant 0 : index
    %4 = vector.load %arg3[%c0_2, %c0_3] : memref<8x128xbf16, #tpu.memory_space<vmem>>, vector<8x128xbf16>
    %c0_4 = arith.constant 0 : index
    %c0_5 = arith.constant 0 : index
    %5 = vector.load %arg4[%c0_4, %c0_5] : memref<128x128xbf16, #tpu.memory_space<vmem>>, vector<128x128xbf16>
    %cst = arith.constant dense<0.000000e+00> : vector<8x128xf32>
    %6 = tpu.matmul %4, %5, %cst {dimension_numbers = #tpu.dot_dimension_numbers<[1], [0], [0], [1], [0, 0, 1, 1], [], []>} : vector<8x128xbf16>, vector<128x128xbf16>, vector<8x128xf32> -> vector<8x128xf32>
    %7 = arith.addf %3, %6 : vector<8x128xf32>
    %c0_6 = arith.constant 0 : index
    %c0_7 = arith.constant 0 : index
    %8 = vector.load %arg9[%c0_6, %c0_7] : memref<8x128xf32, #tpu.memory_space<vmem>>, vector<8x128xf32>
    tpu.vector_store %arg9[%c0_6, %c0_7], %7 {strides = array<i32>} : memref<8x128xf32, #tpu.memory_space<vmem>>, vector<8x128xf32>,
    %c0_i32_8 = arith.constant 0 : i32
    %9 = arith.cmpi eq, %arg2, %c0_i32_8 : i32
    %10 = arith.extui %9 : i1 to i32
    %c0_i32_9 = arith.constant 0 : i32
    %11 = arith.cmpi ne, %10, %c0_i32_9 : i32
    scf.if %11 {
      %c0_10 = arith.constant 0 : index
      %c0_11 = arith.constant 0 : index
      %12 = vector.load %arg9[%c0_10, %c0_11] : memref<8x128xf32, #tpu.memory_space<vmem>>, vector<8x128xf32>
      %c0_12 = arith.constant 0 : index
      %c0_13 = arith.constant 0 : index
      %13 = vector.load %arg5[%c0_12, %c0_13] : memref<1x128xf32, #tpu.memory_space<vmem>>, vector<1x128xf32>
      %14 = vector.broadcast %13 : vector<1x128xf32> to vector<8x128xf32>
      %15 = arith.mulf %12, %14 : vector<8x128xf32>
      %c0_14 = arith.constant 0 : index
      %c0_15 = arith.constant 0 : index
      %16 = vector.load %arg6[%c0_14, %c0_15] : memref<1x128xf32, #tpu.memory_space<vmem>>, vector<1x128xf32>
      %17 = vector.broadcast %16 : vector<1x128xf32> to vector<8x128xf32>
      %18 = arith.addf %15, %17 : vector<8x128xf32>
      %c0_16 = arith.constant 0 : index
      %c0_17 = arith.constant 0 : index
      %19 = vector.load %arg7[%c0_16, %c0_17] : memref<8x128xbf16, #tpu.memory_space<vmem>>, vector<8x128xbf16>
      %20 = arith.extf %19 : vector<8x128xbf16> to vector<8x128xf32>
      %21 = arith.addf %18, %20 : vector<8x128xf32>
      %cst_18 = arith.constant 0.000000e+00 : f32
      %22 = vector.broadcast %cst_18 : f32 to vector<8x128xf32>
      %23 = arith.maximumf %21, %22 : vector<8x128xf32>
      %24 = arith.truncf %23 : vector<8x128xf32> to vector<8x128xbf16>
      %c0_19 = arith.constant 0 : index
      %c0_20 = arith.constant 0 : index
      %25 = vector.load %arg8[%c0_19, %c0_20] : memref<8x128xbf16, #tpu.memory_space<vmem>>, vector<8x128xbf16>
      tpu.vector_store %arg8[%c0_19, %c0_20], %24 {strides = array<i32>} : memref<8x128xbf16, #tpu.memory_space<vmem>>, vector<8x128xbf16>,
    } else {
    }
    return
  }
  func.func @transform_0(%arg0: i32, %arg1: i32, %arg2: i32) -> (i32, i32) {
    %c0_i32 = arith.constant 0 : i32
    return %arg0, %arg2 : i32, i32
  }
  func.func @transform_1(%arg0: i32, %arg1: i32, %arg2: i32) -> (i32, i32) {
    %c0_i32 = arith.constant 0 : i32
    return %arg2, %arg1 : i32, i32
  }
  func.func @transform_2(%arg0: i32, %arg1: i32, %arg2: i32) -> (i32, i32) {
    %c0_i32 = arith.constant 0 : i32
    %c0_i32_0 = arith.constant 0 : i32
    return %c0_i32, %arg1 : i32, i32
  }
  func.func @transform_3(%arg0: i32, %arg1: i32, %arg2: i32) -> (i32, i32) {
    %c0_i32 = arith.constant 0 : i32
    %c0_i32_0 = arith.constant 0 : i32
    return %c0_i32, %arg1 : i32, i32
  }
  func.func @transform_4(%arg0: i32, %arg1: i32, %arg2: i32) -> (i32, i32) {
    %c0_i32 = arith.constant 0 : i32
    return %arg0, %arg1 : i32, i32
  }
  func.func @transform_5(%arg0: i32, %arg1: i32, %arg2: i32) -> (i32, i32) {
    %c0_i32 = arith.constant 0 : i32
    return %arg0, %arg1 : i32, i32
  }
}

module attributes {stable_mosaic.version = 11 : i64} {
  func.func @_head_kernel(%arg0: i32, %arg1: memref<8x4x128xbf16, #tpu.memory_space<vmem>>, %arg2: memref<128x256xbf16, #tpu.memory_space<vmem>>, %arg3: memref<1x256xf32, #tpu.memory_space<vmem>>, %arg4: memref<256x128xbf16, #tpu.memory_space<vmem>>, %arg5: memref<1x128xf32, #tpu.memory_space<vmem>>, %arg6: memref<8x128xf32, #tpu.memory_space<vmem>>) attributes {dimension_semantics = [#tpu.dimension_semantics<arbitrary>], iteration_bounds = array<i64: 1>, scalar_prefetch = 0 : i64, scratch_operands = 0 : i64, tpu.core_type = #tpu.core_type<tc>, window_params = [{pipeline_mode = #tpu.pipeline_mode<synchronous>, transform_indices = @transform_0, window_bounds = array<i64: 8, 4, 128>}, {pipeline_mode = #tpu.pipeline_mode<synchronous>, transform_indices = @transform_1, window_bounds = array<i64: 128, 256>}, {pipeline_mode = #tpu.pipeline_mode<synchronous>, transform_indices = @transform_2, window_bounds = array<i64: 1, 256>}, {pipeline_mode = #tpu.pipeline_mode<synchronous>, transform_indices = @transform_3, window_bounds = array<i64: 256, 128>}, {pipeline_mode = #tpu.pipeline_mode<synchronous>, transform_indices = @transform_4, window_bounds = array<i64: 1, 128>}, {pipeline_mode = #tpu.pipeline_mode<synchronous>, transform_indices = @transform_5, window_bounds = array<i64: 8, 128>}]} {
    %c0 = arith.constant 0 : index
    %c0_0 = arith.constant 0 : index
    %c0_1 = arith.constant 0 : index
    %0 = vector.load %arg1[%c0, %c0_0, %c0_1] : memref<8x4x128xbf16, #tpu.memory_space<vmem>>, vector<8x4x128xbf16>
    %1 = arith.extf %0 : vector<8x4x128xbf16> to vector<8x4x128xf32>
    %cst = arith.constant dense<0.000000e+00> : vector<8x128xf32>
    %2 = vector.multi_reduction <add>, %1, %cst [1] : vector<8x4x128xf32> to vector<8x128xf32>
    %cst_2 = arith.constant 2.500000e-01 : f32
    %3 = vector.broadcast %cst_2 : f32 to vector<8x128xf32>
    %4 = arith.mulf %2, %3 : vector<8x128xf32>
    %5 = arith.truncf %4 : vector<8x128xf32> to vector<8x128xbf16>
    %c0_3 = arith.constant 0 : index
    %c0_4 = arith.constant 0 : index
    %6 = vector.load %arg2[%c0_3, %c0_4] : memref<128x256xbf16, #tpu.memory_space<vmem>>, vector<128x256xbf16>
    %cst_5 = arith.constant dense<0.000000e+00> : vector<8x256xf32>
    %7 = tpu.matmul %5, %6, %cst_5 {dimension_numbers = #tpu.dot_dimension_numbers<[1], [0], [0], [1], [0, 0, 1, 1], [], []>} : vector<8x128xbf16>, vector<128x256xbf16>, vector<8x256xf32> -> vector<8x256xf32>
    %c0_6 = arith.constant 0 : index
    %c0_7 = arith.constant 0 : index
    %8 = vector.load %arg3[%c0_6, %c0_7] : memref<1x256xf32, #tpu.memory_space<vmem>>, vector<1x256xf32>
    %9 = vector.broadcast %8 : vector<1x256xf32> to vector<8x256xf32>
    %10 = arith.addf %7, %9 : vector<8x256xf32>
    %cst_8 = arith.constant 0.000000e+00 : f32
    %11 = vector.broadcast %cst_8 : f32 to vector<8x256xf32>
    %12 = arith.maximumf %10, %11 : vector<8x256xf32>
    %13 = arith.truncf %12 : vector<8x256xf32> to vector<8x256xbf16>
    %c0_9 = arith.constant 0 : index
    %c0_10 = arith.constant 0 : index
    %14 = vector.load %arg4[%c0_9, %c0_10] : memref<256x128xbf16, #tpu.memory_space<vmem>>, vector<256x128xbf16>
    %cst_11 = arith.constant dense<0.000000e+00> : vector<8x128xf32>
    %15 = tpu.matmul %13, %14, %cst_11 {dimension_numbers = #tpu.dot_dimension_numbers<[1], [0], [0], [1], [0, 0, 1, 1], [], []>} : vector<8x256xbf16>, vector<256x128xbf16>, vector<8x128xf32> -> vector<8x128xf32>
    %c0_12 = arith.constant 0 : index
    %c0_13 = arith.constant 0 : index
    %16 = vector.load %arg5[%c0_12, %c0_13] : memref<1x128xf32, #tpu.memory_space<vmem>>, vector<1x128xf32>
    %17 = vector.broadcast %16 : vector<1x128xf32> to vector<8x128xf32>
    %18 = arith.addf %15, %17 : vector<8x128xf32>
    %cst_14 = arith.constant 0.000000e+00 : f32
    %19 = vector.broadcast %cst_14 : f32 to vector<8x128xf32>
    %20 = arith.maximumf %18, %19 : vector<8x128xf32>
    %c0_15 = arith.constant 0 : index
    %c0_16 = arith.constant 0 : index
    %21 = vector.load %arg6[%c0_15, %c0_16] : memref<8x128xf32, #tpu.memory_space<vmem>>, vector<8x128xf32>
    tpu.vector_store %arg6[%c0_15, %c0_16], %20 {strides = array<i32>} : memref<8x128xf32, #tpu.memory_space<vmem>>, vector<8x128xf32>,
    return
  }
  func.func @transform_0(%arg0: i32) -> (i32, i32, i32) {
    %c0_i32 = arith.constant 0 : i32
    %c0_i32_0 = arith.constant 0 : i32
    %c0_i32_1 = arith.constant 0 : i32
    %c0_i32_2 = arith.constant 0 : i32
    return %c0_i32, %c0_i32_0, %c0_i32_1 : i32, i32, i32
  }
  func.func @transform_1(%arg0: i32) -> (i32, i32) {
    %c0_i32 = arith.constant 0 : i32
    %c0_i32_0 = arith.constant 0 : i32
    %c0_i32_1 = arith.constant 0 : i32
    return %c0_i32, %c0_i32_0 : i32, i32
  }
  func.func @transform_2(%arg0: i32) -> (i32, i32) {
    %c0_i32 = arith.constant 0 : i32
    %c0_i32_0 = arith.constant 0 : i32
    %c0_i32_1 = arith.constant 0 : i32
    return %c0_i32, %c0_i32_0 : i32, i32
  }
  func.func @transform_3(%arg0: i32) -> (i32, i32) {
    %c0_i32 = arith.constant 0 : i32
    %c0_i32_0 = arith.constant 0 : i32
    %c0_i32_1 = arith.constant 0 : i32
    return %c0_i32, %c0_i32_0 : i32, i32
  }
  func.func @transform_4(%arg0: i32) -> (i32, i32) {
    %c0_i32 = arith.constant 0 : i32
    %c0_i32_0 = arith.constant 0 : i32
    %c0_i32_1 = arith.constant 0 : i32
    return %c0_i32, %c0_i32_0 : i32, i32
  }
  func.func @transform_5(%arg0: i32) -> (i32, i32) {
    %c0_i32 = arith.constant 0 : i32
    %c0_i32_0 = arith.constant 0 : i32
    %c0_i32_1 = arith.constant 0 : i32
    return %c0_i32, %c0_i32_0 : i32, i32
  }
}

</mosaic_0001>

<bundles_post_ra>
// kernel: _lambda_.12
= control target key start
LH: loop header
LB: loop body
LE: loop exit
PB: predicated region body
PF: predicated region fallthrough
CT: control target
= control target key end

     0   :  { %s233_s0 = inlined_call_operand.vmem [shape: bf16[24,128], index: 0, kind: input, shape index: {}]   ;;  %s234_s1 = inlined_call_operand.vmem [shape: bf16[24,128], index: 1, kind: input, shape index: {}]   ;;  %s235_s2 = inlined_call_operand.vmem [shape: bf16[24,128], index: 2, kind: input, shape index: {}]   ;;  %s236_s3 = inlined_call_operand.vmem [shape: bf16[24,128], index: 3, kind: input, shape index: {}]   ;;  %s237_s4 = inlined_call_operand.vmem [shape: bf16[24,128], index: 4, kind: input, shape index: {}]   ;;  %s238_s5 = inlined_call_operand.vmem [shape: bf16[24,128], index: 5, kind: input, shape index: {}]   ;;  %s239_s6 = inlined_call_operand.vmem [shape: bf16[24,128], index: 6, kind: input, shape index: {}]   ;;  %s240_s7 = inlined_call_operand.vmem [shape: bf16[24,128], index: 7, kind: input, shape index: {}]   ;;  %s241_s8 = inlined_call_operand.vmem [shape: bf16[24,128], index: 8, kind: input, shape index: {}]   ;;  %s242_s9 = inlined_call_operand.vmem [shape: bf16[24,128], index: 9, kind: output, shape index: {}]  }
   0x1   :  { %v32_v0 = vld [vmem:[%s233_s0] sm:$0xf]  ;;  %v33_v1 = vld [vmem:[%s233_s0 + $0x4] sm:$0xf]  ;;  %v34_v26 = vld [vmem:[%s233_s0 + $0x8] sm:$0xf] }
   0x2   :  { %v35_v2 = vld [vmem:[%s234_s1] sm:$0xf]  ;;  %v36_v3 = vld [vmem:[%s234_s1 + $0x4] sm:$0xf]  ;;  %v37_v27 = vld [vmem:[%s234_s1 + $0x8] sm:$0xf] }
   0x3   :  { %v38_v4 = vmax.bf16 %v35_v2, %v32_v0  ;;  %v41_v5 = vld [vmem:[%s235_s2] sm:$0xf]  ;;  %v42_v6 = vld [vmem:[%s235_s2 + $0x4] sm:$0xf]  ;;  %v39_v7 = vmax.bf16 %v36_v3, %v33_v1  ;;  %v43_v28 = vld [vmem:[%s235_s2 + $0x8] sm:$0xf]  ;;  %v40_v30 = vmax.bf16 %v37_v27, %v34_v26 }
   0x4   :  { %v44_v8 = vld [vmem:[%s236_s3] sm:$0xf]  ;;  %v45_v9 = vld [vmem:[%s236_s3 + $0x4] sm:$0xf]  ;;  %v46_v31 = vld [vmem:[%s236_s3 + $0x8] sm:$0xf] }
   0x5   :  { %v53_v10 = vld [vmem:[%s237_s4] sm:$0xf]  ;;  %v47_v11 = vmax.bf16 %v44_v8, %v41_v5  ;;  %v48_v12 = vmax.bf16 %v45_v9, %v42_v6  ;;  %v54_v13 = vld [vmem:[%s237_s4 + $0x4] sm:$0xf]  ;;  %v55_v32 = vld [vmem:[%s237_s4 + $0x8] sm:$0xf]  ;;  %v49_v36 = vmax.bf16 %v46_v31, %v43_v28 }
   0x6   :  { %v56_v14 = vld [vmem:[%s238_s5] sm:$0xf]  ;;  %v57_v15 = vld [vmem:[%s238_s5 + $0x4] sm:$0xf]  ;;  %v58_v33 = vld [vmem:[%s238_s5 + $0x8] sm:$0xf] }
   0x7   :  { %v59_v16 = vmax.bf16 %v56_v14, %v53_v10  ;;  %v60_v17 = vmax.bf16 %v57_v15, %v54_v13  ;;  %v62_v18 = vld [vmem:[%s239_s6] sm:$0xf]  ;;  %v63_v19 = vld [vmem:[%s239_s6 + $0x4] sm:$0xf]  ;;  %v50_v21 = vmax.bf16 %v47_v11, %v38_v4  ;;  %v51_v24 = vmax.bf16 %v48_v12, %v39_v7  ;;  %v64_v38 = vld [vmem:[%s239_s6 + $0x8] sm:$0xf] }
   0x8   :  { %v65_v20 = vld [vmem:[%s240_s7] sm:$0xf]  ;;  %v66_v22 = vld [vmem:[%s240_s7 + $0x4] sm:$0xf]  ;;  %v61_v37 = vmax.bf16 %v58_v33, %v55_v32  ;;  %v67_v39 = vld [vmem:[%s240_s7 + $0x8] sm:$0xf]  ;;  %v52_v44 = vmax.bf16 %v49_v36, %v40_v30 }
   0x9   :  { %v68_v23 = vmax.bf16 %v65_v20, %v62_v18  ;;  %v69_v25 = vmax.bf16 %v66_v22, %v63_v19  ;;  %v77_v35 = vld [vmem:[%s241_s8] sm:$0xf]  ;;  %v78_v41 = vld [vmem:[%s241_s8 + $0x4] sm:$0xf]  ;;  %v70_v42 = vmax.bf16 %v67_v39, %v64_v38  ;;  %v79_v48 = vld [vmem:[%s241_s8 + $0x8] sm:$0xf] }
   0xb   :  { %v71_v29 = vmax.bf16 %v68_v23, %v59_v16  ;;  %v72_v34 = vmax.bf16 %v69_v25, %v60_v17  ;;  %v73_v46 = vmax.bf16 %v70_v42, %v61_v37 }
   0xd   :  { %v74_v40 = vmax.bf16 %v71_v29, %v50_v21  ;;  %v75_v43 = vmax.bf16 %v72_v34, %v51_v24  ;;  %v76_v49 = vmax.bf16 %v73_v46, %v52_v44 }
   0xf   :  { %v80_v45 = vmax.bf16 %v77_v35, %v74_v40  ;;  %v81_v47 = vmax.bf16 %v78_v41, %v75_v43  ;;  %v82_v51 = vmax.bf16 %v79_v48, %v76_v49 }
  0x11   :  { %v95_v50 = vcombine.low %v80_v45, %v81_v47  ;;  %85 = vst [vmem:[%s242_s9 + $0x8] sm:$0xf] %v82_v51 }
  0x13   :  { %94 = vst [vmem:[%s242_s9] sm:$0xff] %v95_v50  }

// kernel: _lambda_.11
= control target key start
LH: loop header
LB: loop body
LE: loop exit
PB: predicated region body
PF: predicated region fallthrough
CT: control target
= control target key end

     0   :  { %s992_s1 = inlined_call_operand.vmem [shape: bf16[256,128], index: 1, kind: input, shape index: {}]   ;;  %s993_s0 = inlined_call_operand.vmem [shape: bf16[128,256], index: 0, kind: input, shape index: {}]   ;;  %s994_s2 = inlined_call_operand.vmem [shape: f32[1,128], index: 2, kind: input, shape index: {}]   ;;  %s995_s3 = inlined_call_operand.vmem [shape: f32[1,128], index: 3, kind: input, shape index: {}]   ;;  %s996_s4 = inlined_call_operand.vmem [shape: bf16[128,128], index: 4, kind: output, shape index: {}]  }
   0x1   :  { %v765_v0 = vld [vmem:[%s992_s1 + $0x78] sm:$0xff]   ;;  %v767_v2 = vld [vmem:[%s992_s1 + $0x70] sm:$0xff]   ;;  %v769_v4 = vld [vmem:[%s992_s1 + $0x68] sm:$0xff]  }
   0x2   :  { %v766_v1 = vld [vmem:[%s992_s1 + $0x38] sm:$0xff]   ;;  %685 = vmatprep.subr.bf16.mxu0 %v765_v0  ;;  %749 = vmatprep.subr.bf16.mxu1 %v765_v0  ;;  %v768_v3 = vld [vmem:[%s992_s1 + $0x30] sm:$0xff]   ;;  %v770_v5 = vld [vmem:[%s992_s1 + $0x28] sm:$0xff]  }
   0x3   :  { %686 = vmatpush3.bf16.msra.mxu0 %v766_v1  ;;  %757 = vmatpush3.bf16.msra.mxu1 %v766_v1  ;;  %v771_v6 = vld [vmem:[%s992_s1 + $0x60] sm:$0xff]   ;;  %v773_v8 = vld [vmem:[%s992_s1 + $0x58] sm:$0xff]   ;;  %v775_v10 = vld [vmem:[%s992_s1 + $0x50] sm:$0xff]  }
   0x4   :  { %687 = vmatprep.subr.bf16.mxu0 %v767_v2  ;;  %750 = vmatprep.subr.bf16.mxu1 %v767_v2  ;;  %v772_v7 = vld [vmem:[%s992_s1 + $0x20] sm:$0xff]   ;;  %v774_v9 = vld [vmem:[%s992_s1 + $0x18] sm:$0xff]   ;;  %v776_v13 = vld [vmem:[%s992_s1 + $0x10] sm:$0xff]  }
   0x5   :  { %v783_v11 = vld [vmem:[%s993_s0 + $0x4] ss:$8 sps:$4 sm:$0xff]   ;;  %v781_v18 = vld [vmem:[%s993_s0] ss:$8 sps:$4 sm:$0xff]   ;;  %v787_v20 = vld [vmem:[%s993_s0 + $0x14] ss:$8 sps:$4 sm:$0xff]  }
   0x6   :  { %v786_v12 = vld [vmem:[%s993_s0 + $0x44] ss:$8 sps:$4 sm:$0xff]   ;;  %310 = vmatprep.mubr.bf16.mxu0 %v783_v11  ;;  %v784_v19 = vld [vmem:[%s993_s0 + $0x40] ss:$8 sps:$4 sm:$0xff]   ;;  %v789_v21 = vld [vmem:[%s993_s0 + $0x54] ss:$8 sps:$4 sm:$0xff]  }
   0x7   :  { %688 = vmatpush3.bf16.msra.mxu0 %v768_v3  ;;  %758 = vmatpush3.bf16.msra.mxu1 %v768_v3  ;;  %v777_v14 = vld [vmem:[%s992_s1 + $0x48] sm:$0xff]   ;;  %v779_v16 = vld [vmem:[%s992_s1 + $0x40] sm:$0xff]   ;;  %v791_v22 = vld [vmem:[%s993_s0 + $0x10] ss:$8 sps:$4 sm:$0xff]  }
   0x8   :  { %689 = vmatprep.subr.bf16.mxu0 %v769_v4  ;;  %751 = vmatprep.subr.bf16.mxu1 %v769_v4  ;;  %v778_v15 = vld [vmem:[%s992_s1 + $0x8] sm:$0xff]   ;;  %v780_v17 = vld [vmem:[%s992_s1] sm:$0xff]   ;;  %v792_v23 = vld [vmem:[%s993_s0 + $0x50] ss:$8 sps:$4 sm:$0xff]  }
   0x9   :  { %342 = vmatprep.mubr.bf16.mxu1 %v786_v12  ;;  %v793_v24 = vld [vmem:[%s993_s0 + $0x24] ss:$8 sps:$4 sm:$0xff]   ;;  %v797_v26 = vld [vmem:[%s993_s0 + $0x20] ss:$8 sps:$4 sm:$0xff]   ;;  %v799_v28 = vld [vmem:[%s993_s0 + $0x34] ss:$8 sps:$4 sm:$0xff]  }
   0xa   :  { %v795_v25 = vld [vmem:[%s993_s0 + $0x64] ss:$8 sps:$4 sm:$0xff]   ;;  %v798_v27 = vld [vmem:[%s993_s0 + $0x60] ss:$8 sps:$4 sm:$0xff]   ;;  %v801_v29 = vld [vmem:[%s993_s0 + $0x74] ss:$8 sps:$4 sm:$0xff]  }
   0xb   :  { %690 = vmatpush3.bf16.msra.mxu0 %v770_v5  ;;  %759 = vmatpush3.bf16.msra.mxu1 %v770_v5  ;;  %v803_v30 = vld [vmem:[%s993_s0 + $0x30] ss:$8 sps:$4 sm:$0xff]   ;;  %v929_v35 = vld [vmem:[%s994_s2] ss:$0 sm:$0xff] }
   0xc   :  { %691 = vmatprep.subr.bf16.mxu0 %v771_v6  ;;  %752 = vmatprep.subr.bf16.mxu1 %v771_v6  ;;  %v804_v31 = vld [vmem:[%s993_s0 + $0x70] ss:$8 sps:$4 sm:$0xff]   ;;  %v936_v43 = vld [vmem:[%s995_s3] ss:$0 sm:$0xff] }
   0xf   :  { %692 = vmatpush3.bf16.msra.mxu0 %v772_v7  ;;  %760 = vmatpush3.bf16.msra.mxu1 %v772_v7 }
  0x10   :  { %693 = vmatprep.subr.bf16.mxu0 %v773_v8  ;;  %753 = vmatprep.subr.bf16.mxu1 %v773_v8 }
  0x13   :  { %694 = vmatpush3.bf16.msra.mxu0 %v774_v9  ;;  %761 = vmatpush3.bf16.msra.mxu1 %v774_v9 }
  0x14   :  { %695 = vmatprep.subr.bf16.mxu0 %v775_v10  ;;  %754 = vmatprep.subr.bf16.mxu1 %v775_v10 }
  0x17   :  { %696 = vmatpush3.bf16.msra.mxu0 %v776_v13  ;;  %762 = vmatpush3.bf16.msra.mxu1 %v776_v13 }
  0x18   :  { %697 = vmatprep.subr.bf16.mxu0 %v777_v14  ;;  %755 = vmatprep.subr.bf16.mxu1 %v777_v14 }
  0x1b   :  { %698 = vmatpush3.bf16.msra.mxu0 %v778_v15  ;;  %763 = vmatpush3.bf16.msra.mxu1 %v778_v15 }
  0x1c   :  { %699 = vmatprep.subr.bf16.mxu0 %v779_v16  ;;  %756 = vmatprep.subr.bf16.mxu1 %v779_v16 }
  0x1f   :  { %700 = vmatpush3.bf16.msra.mxu0 %v780_v17  ;;  %764 = vmatpush3.bf16.msra.mxu1 %v780_v17 }
  0x22   :  { %311 = vmatmul.mubr.bf16.vlgmr.msra.gmra.mxu0 %v781_v18  ;;  %343 = vmatmul.mubr.bf16.vlgmr.msra.gmra.mxu1 %v784_v19 }
  0x23   :  { %318 = vmatprep.mubr.bf16.mxu0 %v787_v20  ;;  %350 = vmatprep.mubr.bf16.mxu1 %v789_v21 }
  0x2a   :  { %319 = vmatmul.mubr.bf16.gmra.mxu0 %v791_v22  ;;  %351 = vmatmul.mubr.bf16.gmra.mxu1 %v792_v23 }
  0x2b   :  { %326 = vmatprep.mubr.bf16.mxu0 %v793_v24  ;;  %358 = vmatprep.mubr.bf16.mxu1 %v795_v25 }
  0x32   :  { %327 = vmatmul.mubr.bf16.gmra.mxu0 %v797_v26  ;;  %359 = vmatmul.mubr.bf16.gmra.mxu1 %v798_v27 }
  0x33   :  { %334 = vmatprep.mubr.bf16.mxu0 %v799_v28  ;;  %366 = vmatprep.mubr.bf16.mxu1 %v801_v29 }
  0x3a   :  { %335 = vmatmul.mubr.bf16.gmra.mxu0 %v803_v30  ;;  %367 = vmatmul.mubr.bf16.gmra.mxu1 %v804_v31 }
  0xe2   :  { %v701_v32 = vpop.f32.mrf.mxu0  ;;  %v725_v33 = vpop.f32.mrf.mxu1 }
  0xe4   :  { %v702_v34 = vpop.f32.mrf.mxu0  ;;  %v726_v36 = vpop.f32.mrf.mxu1 }
  0xe5   :  { %v703_v37 = vadd.f32 %v702_v34, %v701_v32  ;;  %v727_v38 = vadd.f32 %v726_v36, %v725_v33 }
  0xe6   :  { %v704_v39 = vpop.f32.mrf.mxu0  ;;  %v728_v40 = vpop.f32.mrf.mxu1 }
  0xe7   :  { %v433_v41 = vmul.f32 %v703_v37, %v929_v35  ;;  %v441_v42 = vmul.f32 %v727_v38, %v929_v35 }
  0xe8   :  { %v705_v44 = vpop.f32.mrf.mxu0  ;;  %v729_v45 = vpop.f32.mrf.mxu1 }
  0xe9   :  { %v706_v46 = vadd.f32 %v705_v44, %v704_v39  ;;  %v730_v47 = vadd.f32 %v729_v45, %v728_v40  ;;  %v456_v50 = vadd.f32 %v936_v43, %v433_v41  ;;  %v464_v51 = vadd.f32 %v936_v43, %v441_v42 }
  0xea   :  { %v707_v48 = vpop.f32.mrf.mxu0  ;;  %v731_v49 = vpop.f32.mrf.mxu1 }
  0xeb   :  { %v434_v52 = vmul.f32 %v706_v46, %v929_v35  ;;  %v442_v53 = vmul.f32 %v730_v47, %v929_v35  ;;  %v472_v62 = vmax.f32 %v456_v50, 0.0  ;;  %v480_v63 = vmax.f32 %v464_v51, 0.0 }
  0xec   :  { %v708_v54 = vpop.f32.mrf.mxu0  ;;  %v732_v55 = vpop.f32.mrf.mxu1 }
  0xed   :  { %v457_v56 = vadd.f32 %v936_v43, %v434_v52  ;;  %v465_v57 = vadd.f32 %v936_v43, %v442_v53  ;;  %v709_v58 = vadd.f32 %v708_v54, %v707_v48  ;;  %v733_v59 = vadd.f32 %v732_v55, %v731_v49 }
  0xee   :  { %v710_v60 = vpop.f32.mrf.mxu0  ;;  %v734_v61 = vpop.f32.mrf.mxu1 }
  0xef   :  { %v473_v0 = vmax.f32 %v457_v56, 0.0  ;;  %v481_v1 = vmax.f32 %v465_v57, 0.0  ;;  %v435_v2 = vmul.f32 %v709_v58, %v929_v35  ;;  %v443_v3 = vmul.f32 %v733_v59, %v929_v35 }
  0xf0   :  { %v711_v4 = vpop.f32.mrf.mxu0  ;;  %v735_v5 = vpop.f32.mrf.mxu1 }
  0xf1   :  { %v641_v6 = vpack.c.bf16 %v473_v0, %v472_v62  ;;  %v661_v7 = vpack.c.bf16 %v481_v1, %v480_v63  ;;  %v712_v8 = vadd.f32 %v711_v4, %v710_v60  ;;  %v736_v9 = vadd.f32 %v735_v5, %v734_v61 }
  0xf2   :  { %v713_v10 = vpop.f32.mrf.mxu0  ;;  %v737_v11 = vpop.f32.mrf.mxu1  ;;  %v458_v12 = vadd.f32 %v936_v43, %v435_v2  ;;  %v466_v13 = vadd.f32 %v936_v43, %v443_v3 }
  0xf3   :  { %642 = vst [vmem:[%s996_s4] sm:$0xff] %v641_v6   ;;  %681 = vst [vmem:[%s996_s4 + $0x20] sm:$0xff] %v661_v7   ;;  %v436_v14 = vmul.f32 %v712_v8, %v929_v35  ;;  %v444_v15 = vmul.f32 %v736_v9, %v929_v35 }
  0xf4   :  { %v714_v16 = vpop.f32.mrf.mxu0  ;;  %v738_v17 = vpop.f32.mrf.mxu1  ;;  %v474_v26 = vmax.f32 %v458_v12, 0.0  ;;  %v482_v27 = vmax.f32 %v466_v13, 0.0 }
  0xf5   :  { %v715_v18 = vadd.f32 %v714_v16, %v713_v10  ;;  %v739_v19 = vadd.f32 %v738_v17, %v737_v11  ;;  %v459_v20 = vadd.f32 %v936_v43, %v436_v14  ;;  %v467_v21 = vadd.f32 %v936_v43, %v444_v15 }
  0xf6   :  { %v716_v22 = vpop.f32.mrf.mxu0  ;;  %v740_v23 = vpop.f32.mrf.mxu1 }
  0xf7   :  { %v437_v24 = vmul.f32 %v715_v18, %v929_v35  ;;  %v445_v25 = vmul.f32 %v739_v19, %v929_v35  ;;  %v475_v28 = vmax.f32 %v459_v20, 0.0  ;;  %v483_v29 = vmax.f32 %v467_v21, 0.0 }
  0xf8   :  { %v717_v30 = vpop.f32.mrf.mxu0  ;;  %v741_v31 = vpop.f32.mrf.mxu1 }
  0xf9   :  { %v718_v32 = vadd.f32 %v717_v30, %v716_v22  ;;  %v742_v33 = vadd.f32 %v741_v31, %v740_v23  ;;  %v646_v34 = vpack.c.bf16 %v475_v28, %v474_v26  ;;  %v666_v36 = vpack.c.bf16 %v483_v29, %v482_v27 }
  0xfa   :  { %v719_v37 = vpop.f32.mrf.mxu0  ;;  %v743_v38 = vpop.f32.mrf.mxu1  ;;  %v460_v39 = vadd.f32 %v936_v43, %v437_v24  ;;  %v468_v40 = vadd.f32 %v936_v43, %v445_v25 }
  0xfb   :  { %v438_v41 = vmul.f32 %v718_v32, %v929_v35  ;;  %v446_v42 = vmul.f32 %v742_v33, %v929_v35  ;;  %678 = vst [vmem:[%s996_s4 + $0x8] sm:$0xff] %v646_v34   ;;  %682 = vst [vmem:[%s996_s4 + $0x28] sm:$0xff] %v666_v36  }
  0xfc   :  { %v720_v44 = vpop.f32.mrf.mxu0  ;;  %v744_v45 = vpop.f32.mrf.mxu1  ;;  %v476_v52 = vmax.f32 %v460_v39, 0.0  ;;  %v484_v53 = vmax.f32 %v468_v40, 0.0 }
  0xfd   :  { %v461_v46 = vadd.f32 %v936_v43, %v438_v41  ;;  %v469_v47 = vadd.f32 %v936_v43, %v446_v42  ;;  %v721_v48 = vadd.f32 %v720_v44, %v719_v37  ;;  %v745_v49 = vadd.f32 %v744_v45, %v743_v38 }
  0xfe   :  { %v722_v50 = vpop.f32.mrf.mxu0  ;;  %v746_v51 = vpop.f32.mrf.mxu1 }
  0xff   :  { %v477_v54 = vmax.f32 %v461_v46, 0.0  ;;  %v485_v55 = vmax.f32 %v469_v47, 0.0  ;;  %v439_v56 = vmul.f32 %v721_v48, %v929_v35  ;;  %v447_v57 = vmul.f32 %v745_v49, %v929_v35 }
 0x100   :  { %v723_v58 = vpop.f32.mrf.mxu0  ;;  %v747_v59 = vpop.f32.mrf.mxu1 }
 0x101   :  { %v651_v60 = vpack.c.bf16 %v477_v54, %v476_v52  ;;  %v671_v61 = vpack.c.bf16 %v485_v55, %v484_v53  ;;  %v724_v62 = vadd.f32 %v723_v58, %v722_v50  ;;  %v748_v63 = vadd.f32 %v747_v59, %v746_v51 }
 0x102   :  { %v462_v0 = vadd.f32 %v936_v43, %v439_v56  ;;  %v470_v1 = vadd.f32 %v936_v43, %v447_v57 }
 0x103   :  { %679 = vst [vmem:[%s996_s4 + $0x10] sm:$0xff] %v651_v60   ;;  %683 = vst [vmem:[%s996_s4 + $0x30] sm:$0xff] %v671_v61   ;;  %v440_v2 = vmul.f32 %v724_v62, %v929_v35  ;;  %v448_v3 = vmul.f32 %v748_v63, %v929_v35 }
 0x104   :  { %v478_v6 = vmax.f32 %v462_v0, 0.0  ;;  %v486_v7 = vmax.f32 %v470_v1, 0.0 }
 0x105   :  { %v463_v4 = vadd.f32 %v936_v43, %v440_v2  ;;  %v471_v5 = vadd.f32 %v936_v43, %v448_v3 }
 0x107   :  { %v479_v8 = vmax.f32 %v463_v4, 0.0  ;;  %v487_v9 = vmax.f32 %v471_v5, 0.0 }
 0x109   :  { %v656_v10 = vpack.c.bf16 %v479_v8, %v478_v6  ;;  %v676_v11 = vpack.c.bf16 %v487_v9, %v486_v7 }
 0x10b   :  { %680 = vst [vmem:[%s996_s4 + $0x18] sm:$0xff] %v656_v10   ;;  %684 = vst [vmem:[%s996_s4 + $0x38] sm:$0xff] %v676_v11  }

// kernel: _lambda_.14
= control target key start
LH: loop header
LB: loop body
LE: loop exit
PB: predicated region body
PF: predicated region fallthrough
CT: control target
= control target key end

     0   :  { %s338_s1 = inlined_call_operand.vmem [shape: bf16[128,128], index: 1, kind: input, shape index: {}]   ;;  %s339_s0 = inlined_call_operand.vmem [shape: bf16[24,128], index: 0, kind: input, shape index: {}]   ;;  %s340_s2 = inlined_call_operand.vmem [shape: f32[1,128], index: 2, kind: input, shape index: {}]   ;;  %s341_s3 = inlined_call_operand.vmem [shape: f32[1,128], index: 3, kind: input, shape index: {}]   ;;  %s342_s4 = inlined_call_operand.vmem [shape: bf16[24,128], index: 4, kind: output, shape index: {}]  }
   0x1   :  { %v261_v0 = vld [vmem:[%s338_s1 + $0x38] sm:$0xff]   ;;  %v262_v1 = vld [vmem:[%s338_s1 + $0x30] sm:$0xff]   ;;  %v263_v2 = vld [vmem:[%s338_s1 + $0x28] sm:$0xff]  }
   0x2   :  { %241 = vmatprep.subr.bf16.mxu0 %v261_v0  ;;  %v264_v3 = vld [vmem:[%s338_s1 + $0x20] sm:$0xff]   ;;  %v265_v5 = vld [vmem:[%s338_s1 + $0x18] sm:$0xff]   ;;  %v266_v6 = vld [vmem:[%s338_s1 + $0x10] sm:$0xff]  }
   0x3   :  { %242 = vmatpush3.bf16.msra.mxu0 %v261_v0  ;;  %v269_v4 = vld [vmem:[%s339_s0] sm:$0xff]   ;;  %v267_v7 = vld [vmem:[%s338_s1 + $0x8] sm:$0xff]  }
   0x4   :  { %243 = vmatprep.subr.bf16.mxu0 %v262_v1  ;;  %257 = vmatprep.mubr.bf16.mxu0 %v269_v4  ;;  %v268_v8 = vld [vmem:[%s338_s1] sm:$0xff]   ;;  %v270_v9 = vld [vmem:[%s339_s0 + $0x8] ss:$0 sps:$4 sm:$0xff]  }
   0x5   :  { %v218_v10 = vld [vmem:[%s340_s2] ss:$0 sm:$0xff] }
   0x6   :  { %v219_v12 = vld [vmem:[%s341_s3] ss:$0 sm:$0xff] }
   0x7   :  { %244 = vmatpush3.bf16.msra.mxu0 %v262_v1 }
   0x8   :  { %245 = vmatprep.subr.bf16.mxu0 %v263_v2 }
   0xb   :  { %246 = vmatpush3.bf16.msra.mxu0 %v263_v2 }
   0xc   :  { %247 = vmatprep.subr.bf16.mxu0 %v264_v3 }
   0xf   :  { %248 = vmatpush3.bf16.msra.mxu0 %v264_v3 }
  0x10   :  { %249 = vmatprep.subr.bf16.mxu0 %v265_v5 }
  0x13   :  { %250 = vmatpush3.bf16.msra.mxu0 %v265_v5 }
  0x14   :  { %251 = vmatprep.subr.bf16.mxu0 %v266_v6 }
  0x17   :  { %252 = vmatpush3.bf16.msra.mxu0 %v266_v6 }
  0x18   :  { %253 = vmatprep.subr.bf16.mxu0 %v267_v7 }
  0x1b   :  { %254 = vmatpush3.bf16.msra.mxu0 %v267_v7 }
  0x1c   :  { %255 = vmatprep.subr.bf16.mxu0 %v268_v8 }
  0x1f   :  { %256 = vmatpush3.bf16.msra.mxu0 %v268_v8 }
  0x22   :  { %258 = vmatmul.mubr.bf16.vlgmr.msra.gmra.mxu0 %v270_v9 }
  0xe2   :  { %v259_v11 = vpop.f32.mrf.mxu0 }
  0xe3   :  { %v174_v13 = vmul.f32 %v259_v11, %v218_v10 }
  0xe4   :  { %v139_v14 = vpop.f32.mrf.mxu0 }
  0xe5   :  { %v184_v15 = vadd.f32 %v219_v12, %v174_v13  ;;  %v172_v16 = vmul.f32 %v218_v10, %v139_v14 }
  0xe6   :  { %v260_v17 = vpop.f32.mrf.mxu0 }
  0xe7   :  { %v187_v18 = vmax.f32 %v184_v15, 0.0  ;;  %v182_v21 = vadd.f32 %v219_v12, %v172_v16 }
  0xe8   :  { %v142_v19 = vpop.f32.mrf.mxu0 }
  0xe9   :  { %v225_v20 = vpack.c.bf16 %v187_v18, %v187_v18  ;;  %v173_v22 = vmul.f32 %v218_v10, %v142_v19  ;;  %v185_v24 = vmax.f32 %v182_v21, 0.0 }
  0xeb   :  { %203 = vst [vmem:[%s342_s4 + $0x8] sm:$0xf] %v225_v20  ;;  %v183_v23 = vadd.f32 %v219_v12, %v173_v22 }
  0xed   :  { %v186_v25 = vmax.f32 %v183_v23, 0.0 }
  0xef   :  { %v229_v26 = vpack.c.bf16 %v186_v25, %v185_v24 }
  0xf1   :  { %230 = vst [vmem:[%s342_s4] sm:$0xff] %v229_v26  }

// kernel: _lambda_.13
= control target key start
LH: loop header
LB: loop body
LE: loop exit
PB: predicated region body
PF: predicated region fallthrough
CT: control target
= control target key end

     0   :  { %s335_s1 = inlined_call_operand.vmem [shape: bf16[128,128], index: 1, kind: input, shape index: {}]   ;;  %s336_s0 = inlined_call_operand.vmem [shape: bf16[24,128], index: 0, kind: input, shape index: {}]   ;;  %s337_s2 = inlined_call_operand.vmem [shape: f32[1,128], index: 2, kind: input, shape index: {}]   ;;  %s338_s3 = inlined_call_operand.vmem [shape: f32[1,128], index: 3, kind: input, shape index: {}]   ;;  %s339_s4 = inlined_call_operand.vmem [shape: bf16[24,128], index: 4, kind: output, shape index: {}]  }
   0x1   :  { %v258_v0 = vld [vmem:[%s335_s1 + $0x38] sm:$0xff]   ;;  %v259_v1 = vld [vmem:[%s335_s1 + $0x30] sm:$0xff]   ;;  %v260_v2 = vld [vmem:[%s335_s1 + $0x28] sm:$0xff]  }
   0x2   :  { %238 = vmatprep.subr.bf16.mxu0 %v258_v0  ;;  %v261_v3 = vld [vmem:[%s335_s1 + $0x20] sm:$0xff]   ;;  %v262_v5 = vld [vmem:[%s335_s1 + $0x18] sm:$0xff]   ;;  %v263_v6 = vld [vmem:[%s335_s1 + $0x10] sm:$0xff]  }
   0x3   :  { %239 = vmatpush3.bf16.msra.mxu0 %v258_v0  ;;  %v266_v4 = vld [vmem:[%s336_s0] sm:$0xff]   ;;  %v264_v7 = vld [vmem:[%s335_s1 + $0x8] sm:$0xff]  }
   0x4   :  { %240 = vmatprep.subr.bf16.mxu0 %v259_v1  ;;  %254 = vmatprep.mubr.bf16.mxu0 %v266_v4  ;;  %v265_v8 = vld [vmem:[%s335_s1] sm:$0xff]   ;;  %v267_v9 = vld [vmem:[%s336_s0 + $0x8] ss:$0 sps:$4 sm:$0xff]  }
   0x5   :  { %v215_v10 = vld [vmem:[%s337_s2] ss:$0 sm:$0xff] }
   0x6   :  { %v216_v12 = vld [vmem:[%s338_s3] ss:$0 sm:$0xff] }
   0x7   :  { %241 = vmatpush3.bf16.msra.mxu0 %v259_v1 }
   0x8   :  { %242 = vmatprep.subr.bf16.mxu0 %v260_v2 }
   0xb   :  { %243 = vmatpush3.bf16.msra.mxu0 %v260_v2 }
   0xc   :  { %244 = vmatprep.subr.bf16.mxu0 %v261_v3 }
   0xf   :  { %245 = vmatpush3.bf16.msra.mxu0 %v261_v3 }
  0x10   :  { %246 = vmatprep.subr.bf16.mxu0 %v262_v5 }
  0x13   :  { %247 = vmatpush3.bf16.msra.mxu0 %v262_v5 }
  0x14   :  { %248 = vmatprep.subr.bf16.mxu0 %v263_v6 }
  0x17   :  { %249 = vmatpush3.bf16.msra.mxu0 %v263_v6 }
  0x18   :  { %250 = vmatprep.subr.bf16.mxu0 %v264_v7 }
  0x1b   :  { %251 = vmatpush3.bf16.msra.mxu0 %v264_v7 }
  0x1c   :  { %252 = vmatprep.subr.bf16.mxu0 %v265_v8 }
  0x1f   :  { %253 = vmatpush3.bf16.msra.mxu0 %v265_v8 }
  0x22   :  { %255 = vmatmul.mubr.bf16.vlgmr.msra.gmra.mxu0 %v267_v9 }
  0xe2   :  { %v256_v11 = vpop.f32.mrf.mxu0 }
  0xe3   :  { %v174_v13 = vmul.f32 %v256_v11, %v215_v10 }
  0xe4   :  { %v139_v14 = vpop.f32.mrf.mxu0 }
  0xe5   :  { %v184_v15 = vadd.f32 %v216_v12, %v174_v13  ;;  %v172_v18 = vmul.f32 %v215_v10, %v139_v14 }
  0xe6   :  { %v257_v16 = vpop.f32.mrf.mxu0 }
  0xe7   :  { %v222_v17 = vpack.c.bf16 %v184_v15, %v184_v15  ;;  %v182_v21 = vadd.f32 %v216_v12, %v172_v18 }
  0xe8   :  { %v142_v19 = vpop.f32.mrf.mxu0 }
  0xe9   :  { %200 = vst [vmem:[%s339_s4 + $0x8] sm:$0xf] %v222_v17  ;;  %v173_v20 = vmul.f32 %v215_v10, %v142_v19 }
  0xeb   :  { %v183_v22 = vadd.f32 %v216_v12, %v173_v20 }
  0xed   :  { %v226_v23 = vpack.c.bf16 %v183_v22, %v182_v21 }
  0xef   :  { %227 = vst [vmem:[%s339_s4] sm:$0xff] %v226_v23  }

// kernel: _lambda_.15
= control target key start
LH: loop header
LB: loop body
LE: loop exit
PB: predicated region body
PF: predicated region fallthrough
CT: control target
= control target key end

     0   :  { %s1107_s15 = smov 0   ;;  %s1109_s16 = smov 0   ;;  %s1219_s0 = inlined_call_operand.vmem [shape: bf16[24,1152], index: 0, kind: input, shape index: {}]   ;;  %s1220_s1 = inlined_call_operand.vmem [shape: bf16[1152,128], index: 1, kind: input, shape index: {}]   ;;  %s1221_s2 = inlined_call_operand.vmem [shape: f32[1,128], index: 2, kind: input, shape index: {}]   ;;  %s1222_s3 = inlined_call_operand.vmem [shape: f32[1,128], index: 3, kind: input, shape index: {}]   ;;  %s1223_s4 = inlined_call_operand.vmem [shape: bf16[24,128], index: 4, kind: output, shape index: {}]  }
   0x1   :  { %s1111_s17 = smov 0   ;;  %s1113_s18 = smov 0  }
   0x2   :  { %s1115_s19 = smov 0  }
   0x3 LB: > { %s26_s20 = sadd.s32 1, %s1075_s18  ;;  %p49_p1 = scmp.ne.s32.totalorder %s1067_s16, %s1063_s15  ;;  %s1079_s19 = sphi %s1115_s19, %s14_s19   ;;  %s1075_s18 = sphi %s1113_s18, %s1227_s18   ;;  %s1071_s17 = sphi %s1111_s17, %s1226_s17   ;;  %s1067_s16 = sphi %s1109_s16, %s1225_s16   ;;  %s1063_s15 = sphi %s1107_s15, %s1224_s15  }
   0x4   : > { %p27_p0 = scmp.ge.s32.totalorder %s26_s20, 3  ;;  %p50_p2 = scmp.eq.s32.totalorder %s1079_s19, 0 }
   0x5   : > { %s42_s22 = sadd.s32 1, %s1067_s16  ;;  %p849_p5 = scmp.ge.s32.totalorder %s1079_s19, 3 }
   0x6   : > { %s1229_s20 = smov (%p27_p0, %s26_s20), 0  ;;  %p51_p3 = por %p50_p2, %p49_p1 }
   0x7   : > { %s38_s21 = ssub.s32 %s1075_s18, %s1229_s20  ;;  %195 = sbr.rel (%p849_p5) target bundleno = 20 (0x14), region = 24 }
   0x8   : > { %p40_p4 = scmp.eq.s32.totalorder %s38_s21, 0 }
   0xa   : > { %s1142_s23 = scalar_select %p40_p4, %s1067_s16, %s42_s22  }
   0xc   : > { %198 = sbr.rel (!%p51_p3) target bundleno = 20 (0x14), region = 28  ;;  %s200_s24 = sand.u32 (%p51_p3), 1, %s1067_s16  }
   0xd   : > { %s900_s25 = smul.u32 (%p51_p3), 12, %s1075_s18 }
   0xe   : > { %s967_s26 = smul.u32 (%p51_p3), 36, %s200_s24 }
   0xf   : > { %s208_s29 = scalar_lea.vmem (%p51_p3), %s1219_s0, %s900_s25 }
  0x10   : > { %v223_v0 = vld [vmem:[%s208_s29] sm:$0xff] (%p51_p3)  ;;  %v227_v2 = vld [vmem:[%s208_s29 + $0x48] sm:$0xff] (%p51_p3)  ;;  %s202_s30 = scalar_lea.vmem (%p51_p3), [#allocation3], %s967_s26  ;;  %v855_v5 = vld [vmem:[%s208_s29 + $0x50] sm:$0xf] (%p51_p3) }
  0x11   : > { %v225_v1 = vld [vmem:[%s208_s29 + $0x24] sm:$0xff]  ;;  %224 = vst [vmem:[%s202_s30] sm:$0xff] %v223_v0  ;;  %228 = vst [vmem:[%s202_s30 + $0x18] sm:$0xff] %v227_v2  ;;  %v853_v4 = vld [vmem:[%s208_s29 + $0x2c] sm:$0xf] }
  0x12   : > { %226 = vst [vmem:[%s202_s30 + $0xc] sm:$0xff] %v225_v1  ;;  %v851_v3 = vld [vmem:[%s208_s29 + $0x8] sm:$0xf]  ;;  %854 = vst [vmem:[%s202_s30 + $0x14] sm:$0xf] %v853_v4 }
  0x13   : > { %852 = vst [vmem:[%s202_s30 + $0x8] sm:$0xf] %v851_v3  ;;  %856 = vst [vmem:[%s202_s30 + $0x20] sm:$0xf] %v855_v5 }
  0x14 PF: > { %p857_p6 = scmp.ge.s32.totalorder %s1079_s19, 1  ;;  %p259_p7 = scmp.lt.s32.totalorder %s1079_s19, 4 }
  0x16   : > { %p260_p8 = pnand %p857_p6, %p259_p7 }
  0x17   : > { %s266_s5 = sand.u32 (!%p260_p8), 1, %s1063_s15   ;;  %s310_s6 = smul.u32 (!%p260_p8), 48, %s1071_s17 }
  0x18   : > { %263 = sbr.rel (%p260_p8) target bundleno = 297 (0x129), region = 58  ;;  %p859_p10 = scmp.ne.s32.totalorder (!%p260_p8), %s1071_s17, 0 }
  0x19   : > { %s968_s7 = smul.u32 (!%p260_p8), 36, %s266_s5  ;;  %p311_p9 = scmp.lt.s32.totalorder (!%p260_p8), %s310_s6, 143 }
  0x1b   : > { %s1159_s12 = scalar_lea.vmem (!%p260_p8), [#allocation3], %s968_s7 }
  0x1d   : > { %s1231_s6 = smov (!%p311_p9, %s310_s6), 143  ;;  %338 = sbr.rel (%p859_p10) target bundleno = 37 (0x25), region = 66 }
  0x1e   : > { %s858_s8 = sshll.u32 %s1231_s6, 2 }
  0x1f   : > { %s1157_s11 = scalar_lea.vmem %s1220_s1, %s858_s8 }
  0x22   : > { %v1081_v6 = vmov 0.0  }
  0x23   : > { %339 = vst [vmem:[#allocation2 + $0x10] sm:$0xff] %v1081_v6  ;;  %340 = vst [vmem:[#allocation2] sm:$0xff] %v1081_v6 }
  0x24   : > { %341 = vst [vmem:[#allocation2 + $0x8] sm:$0xff] %v1081_v6 }
  0x25 PF: > { %v1010_v7 = vld [vmem:[%s1157_s11 + $0x78] sm:$0xff]   ;;  %v1013_v10 = vld [vmem:[%s1157_s11 + $0x70] sm:$0xff]   ;;  %v1016_v13 = vld [vmem:[%s1157_s11 + $0x68] sm:$0xff]   ;;  %p890_p11 = scmp.ne.s32.totalorder %s1071_s17, 2 }
  0x26   : > { %v1011_v8 = vld [vmem:[%s1157_s11 + $0xb8] sm:$0xff]   ;;  %909 = vmatprep.subr.bf16.mxu0 %v1010_v7  ;;  %v1014_v11 = vld [vmem:[%s1157_s11 + $0xb0] sm:$0xff]   ;;  %v1017_v14 = vld [vmem:[%s1157_s11 + $0xa8] sm:$0xff]  }
  0x27   : > { %v1012_v9 = vld [vmem:[%s1157_s11 + $0x38] sm:$0xff]   ;;  %947 = vmatprep.subr.bf16.mxu1 %v1011_v8  ;;  %v1015_v12 = vld [vmem:[%s1157_s11 + $0x30] sm:$0xff]   ;;  %v1018_v15 = vld [vmem:[%s1157_s11 + $0x28] sm:$0xff]  }
  0x28   : > { %910 = vmatpush3.bf16.msra.mxu0 %v1012_v9  ;;  %948 = vmatpush3.bf16.msra.mxu1 %v1011_v8  ;;  %v1019_v16 = vld [vmem:[%s1157_s11 + $0x60] sm:$0xff]   ;;  %v1022_v19 = vld [vmem:[%s1157_s11 + $0x58] sm:$0xff]   ;;  %v1025_v22 = vld [vmem:[%s1157_s11 + $0x50] sm:$0xff]  }
  0x29   : > { %911 = vmatprep.subr.bf16.mxu0 %v1013_v10  ;;  %949 = vmatprep.subr.bf16.mxu1 %v1014_v11  ;;  %v1020_v17 = vld [vmem:[%s1157_s11 + $0xa0] sm:$0xff]   ;;  %v1023_v20 = vld [vmem:[%s1157_s11 + $0x98] sm:$0xff]   ;;  %v1026_v23 = vld [vmem:[%s1157_s11 + $0x90] sm:$0xff]  }
  0x2a   : > { %v1021_v18 = vld [vmem:[%s1157_s11 + $0x20] sm:$0xff]   ;;  %v1024_v21 = vld [vmem:[%s1157_s11 + $0x18] sm:$0xff]   ;;  %v1027_v24 = vld [vmem:[%s1157_s11 + $0x10] sm:$0xff]  }
  0x2b   : > { %v1028_v25 = vld [vmem:[%s1157_s11 + $0x48] sm:$0xff]   ;;  %v1031_v28 = vld [vmem:[%s1157_s11 + $0x40] sm:$0xff]   ;;  %v349_v33 = vld [vmem:[%s1159_s12 + $0x18] sm:$0xff] }
  0x2c   : > { %912 = vmatpush3.bf16.msra.mxu0 %v1015_v12  ;;  %950 = vmatpush3.bf16.msra.mxu1 %v1014_v11  ;;  %v1029_v26 = vld [vmem:[%s1157_s11 + $0x88] sm:$0xff]   ;;  %v1032_v29 = vld [vmem:[%s1157_s11 + $0x80] sm:$0xff]   ;;  %v1038_v35 = vld [vmem:[%s1159_s12 + $0x20] ss:$0 sps:$4 sm:$0xff]   ;;  %v864_v36 = vcombine.high %v349_v33, %v349_v33  ;;  %v863_v37 = vcombine.low %v349_v33, %v349_v33 }
  0x2d   : > { %913 = vmatprep.subr.bf16.mxu0 %v1016_v13  ;;  %951 = vmatprep.subr.bf16.mxu1 %v1017_v14  ;;  %v1030_v27 = vld [vmem:[%s1157_s11 + $0x8] sm:$0xff]   ;;  %v1033_v32 = vld [vmem:[%s1157_s11] sm:$0xff]   ;;  %v342_v43 = vld [vmem:[#allocation2 + $0x10] sm:$0xff] }
  0x2e   : > { %v1036_v30 = vld [vmem:[%s1159_s12 + $0x4] ss:$12 sps:$4 sm:$0xff]   ;;  %v1037_v31 = vld [vmem:[%s1159_s12 + $0x8] ss:$12 sps:$4 sm:$0xff]   ;;  %v1034_v34 = vld [vmem:[%s1159_s12] ss:$12 sps:$4 sm:$0xff]  }
  0x2f   : > { %602 = vmatprep.mubr.bf16.mxu0 %v1036_v30  ;;  %963 = vmatprep.mubr.bf16.mxu1 %v1037_v31  ;;  %v343_v50 = vld [vmem:[#allocation2] sm:$0xff]  ;;  %v344_v57 = vld [vmem:[#allocation2 + $0x8] sm:$0xff] }
  0x30   : > { %914 = vmatpush3.bf16.msra.mxu0 %v1018_v15  ;;  %952 = vmatpush3.bf16.msra.mxu1 %v1017_v14 }
  0x31   : > { %915 = vmatprep.subr.bf16.mxu0 %v1019_v16  ;;  %953 = vmatprep.subr.bf16.mxu1 %v1020_v17 }
  0x34   : > { %916 = vmatpush3.bf16.msra.mxu0 %v1021_v18  ;;  %954 = vmatpush3.bf16.msra.mxu1 %v1020_v17 }
  0x35   : > { %917 = vmatprep.subr.bf16.mxu0 %v1022_v19  ;;  %955 = vmatprep.subr.bf16.mxu1 %v1023_v20 }
  0x38   : > { %918 = vmatpush3.bf16.msra.mxu0 %v1024_v21  ;;  %956 = vmatpush3.bf16.msra.mxu1 %v1023_v20 }
  0x39   : > { %919 = vmatprep.subr.bf16.mxu0 %v1025_v22  ;;  %957 = vmatprep.subr.bf16.mxu1 %v1026_v23 }
  0x3c   : > { %920 = vmatpush3.bf16.msra.mxu0 %v1027_v24  ;;  %958 = vmatpush3.bf16.msra.mxu1 %v1026_v23 }
  0x3d   : > { %921 = vmatprep.subr.bf16.mxu0 %v1028_v25  ;;  %959 = vmatprep.subr.bf16.mxu1 %v1029_v26 }
  0x40   : > { %922 = vmatpush3.bf16.msra.mxu0 %v1030_v27  ;;  %960 = vmatpush3.bf16.msra.mxu1 %v1029_v26 }
  0x41   : > { %923 = vmatprep.subr.bf16.mxu0 %v1031_v28  ;;  %961 = vmatprep.subr.bf16.mxu1 %v1032_v29 }
  0x44   : > { %924 = vmatpush3.bf16.msra.mxu0 %v1033_v32  ;;  %962 = vmatpush3.bf16.msra.mxu1 %v1032_v29 }
  0x47   : > { %603 = vmatmul.mubr.bf16.vlgmr.msra.gmra.mxu0 %v1034_v34  ;;  %964 = vmatmul.mubr.bf16.vlgmr.msra.gmra.mxu1 %v1038_v35 }
  0x48   : > { %610 = vmatprep.mubr.bf16.mxu0 %v864_v36 }
  0x4f   : > { %611 = vmatmul.mubr.bf16.gmra.mxu0 %v863_v37 }
 0x107   : > { %v925_v38 = vpop.f32.mrf.mxu0  ;;  %v965_v39 = vpop.f32.mrf.mxu1 }
 0x109   : > { %v926_v40 = vpop.f32.mrf.mxu0  ;;  %v652_v41 = vpop.f32.mrf.mxu1 }
 0x10a   : > { %v927_v42 = vadd.f32 %v926_v40, %v925_v38 }
 0x10b   : > { %v928_v44 = vpop.f32.mrf.mxu0  ;;  %v966_v45 = vpop.f32.mrf.mxu1 }
 0x10c   : > { %v653_v46 = vadd.f32 %v927_v42, %v652_v41 }
 0x10d   : > { %v929_v47 = vpop.f32.mrf.mxu0  ;;  %v655_v51 = vpop.f32.mrf.mxu1 }
 0x10e   : > { %v666_v48 = vadd.f32 %v653_v46, %v342_v43  ;;  %v930_v49 = vadd.f32 %v929_v47, %v928_v44 }
 0x10f   : > { %v931_v52 = vpop.f32.mrf.mxu0 }
 0x110   : > { %669 = vst [vmem:[#allocation2 + $0x10] sm:$0xff] %v666_v48  ;;  %v656_v53 = vadd.f32 %v930_v49, %v655_v51 }
 0x111   : > { %v932_v54 = vpop.f32.mrf.mxu0 }
 0x112   : > { %v667_v55 = vadd.f32 %v656_v53, %v343_v50  ;;  %v933_v56 = vadd.f32 %v932_v54, %v931_v52 }
 0x113   : > { %v934_v58 = vpop.f32.mrf.mxu0 }
 0x114   : > { %670 = vst [vmem:[#allocation2] sm:$0xff] %v667_v55  ;;  %v661_v59 = vadd.f32 %v965_v39, %v933_v56  ;;  %675 = sbr.rel (%p890_p11) target bundleno = 297 (0x129), region = 70 }
 0x115   : > { %v935_v60 = vpop.f32.mrf.mxu0 }
 0x116   : > { %v668_v61 = vadd.f32 %v661_v59, %v344_v57 }
 0x118   : > { %671 = vst [vmem:[#allocation2 + $0x8] sm:$0xff] %v668_v61 }
 0x119   : > { %v676_v62 = vld [vmem:[#allocation2 + $0x10] sm:$0xff]  ;;  %v891_v0 = vld [vmem:[%s1221_s2] ss:$0 sm:$0xff] }
 0x11a   : > { %v686_v1 = vmul.f32 %v891_v0, %v676_v62  ;;  %v892_v3 = vld [vmem:[%s1222_s3] ss:$0 sm:$0xff] }
 0x11b   : > { %v677_v63 = vld [vmem:[#allocation2] sm:$0xff] }
 0x11c   : > { %v687_v2 = vmul.f32 %v891_v0, %v677_v63  ;;  %v696_v6 = vadd.f32 %v892_v3, %v686_v1 }
 0x11e   : > { %v697_v7 = vadd.f32 %v892_v3, %v687_v2  ;;  %v699_v9 = vmax.f32 %v696_v6, 0.0 }
 0x11f   : > { %v678_v4 = vld [vmem:[#allocation2 + $0x8] sm:$0xff] }
 0x120   : > { %v688_v5 = vmul.f32 %v891_v0, %v678_v4  ;;  %v700_v10 = vmax.f32 %v697_v7, 0.0 }
 0x122   : > { %v698_v8 = vadd.f32 %v892_v3, %v688_v5  ;;  %v907_v12 = vpack.c.bf16 %v700_v10, %v699_v9 }
 0x124   : > { %v701_v11 = vmax.f32 %v698_v8, 0.0  ;;  %908 = vst [vmem:[%s1223_s4] sm:$0xff] %v907_v12  }
 0x126   : > { %v903_v13 = vpack.c.bf16 %v701_v11, %v701_v11 }
 0x128   : > { %717 = vst [vmem:[%s1223_s4 + $0x8] sm:$0xf] %v903_v13 }
 0x129 PF: > { %s14_s19 = sadd.s32 1, %s1079_s19   ;;  %s1224_s15 = smov %s1067_s16 }
 0x12a   : > { %p11_p12 = scmp.ge.s32.totalorder %s14_s19, 5   ;;  %s1225_s16 = smov %s1142_s23 }
 0x12b   : > { %s1226_s17 = smov %s1075_s18  ;;  %s1227_s18 = smov %s1229_s20 }
 0x12c   :  { %13 = sbr.rel (!%p11_p12) target bundleno = 3 (0x3), region = 120 }

// kernel: _lambda_.16
= control target key start
LH: loop header
LB: loop body
LE: loop exit
PB: predicated region body
PF: predicated region fallthrough
CT: control target
= control target key end

     0   :  { %s365_s1 = inlined_call_operand.vmem [shape: bf16[128,128], index: 1, kind: input, shape index: {}]   ;;  %s366_s0 = inlined_call_operand.vmem [shape: bf16[24,128], index: 0, kind: input, shape index: {}]   ;;  %s367_s2 = inlined_call_operand.vmem [shape: f32[1,128], index: 2, kind: input, shape index: {}]   ;;  %s368_s4 = inlined_call_operand.vmem [shape: bf16[24,128], index: 4, kind: input, shape index: {}]   ;;  %s369_s3 = inlined_call_operand.vmem [shape: f32[1,128], index: 3, kind: input, shape index: {}]   ;;  %s370_s5 = inlined_call_operand.vmem [shape: bf16[24,128], index: 5, kind: output, shape index: {}]  }
   0x1   :  { %v277_v0 = vld [vmem:[%s365_s1 + $0x38] sm:$0xff]   ;;  %v278_v1 = vld [vmem:[%s365_s1 + $0x30] sm:$0xff]   ;;  %v279_v2 = vld [vmem:[%s365_s1 + $0x28] sm:$0xff]  }
   0x2   :  { %257 = vmatprep.subr.bf16.mxu0 %v277_v0  ;;  %v280_v3 = vld [vmem:[%s365_s1 + $0x20] sm:$0xff]   ;;  %v281_v5 = vld [vmem:[%s365_s1 + $0x18] sm:$0xff]   ;;  %v282_v6 = vld [vmem:[%s365_s1 + $0x10] sm:$0xff]  }
   0x3   :  { %258 = vmatpush3.bf16.msra.mxu0 %v277_v0  ;;  %v285_v4 = vld [vmem:[%s366_s0] sm:$0xff]   ;;  %v283_v7 = vld [vmem:[%s365_s1 + $0x8] sm:$0xff]  }
   0x4   :  { %259 = vmatprep.subr.bf16.mxu0 %v278_v1  ;;  %273 = vmatprep.mubr.bf16.mxu0 %v285_v4  ;;  %v284_v8 = vld [vmem:[%s365_s1] sm:$0xff]   ;;  %v286_v9 = vld [vmem:[%s366_s0 + $0x8] ss:$0 sps:$4 sm:$0xff]  }
   0x5   :  { %v230_v10 = vld [vmem:[%s367_s2] ss:$0 sm:$0xff]  ;;  %v190_v11 = vld [vmem:[%s368_s4 + $0x8] sm:$0xf] }
   0x6   :  { %v231_v13 = vld [vmem:[%s369_s3] ss:$0 sm:$0xff]  ;;  %v193_v15 = vunpack.c.l.bf16 %v190_v11 }
   0x7   :  { %260 = vmatpush3.bf16.msra.mxu0 %v278_v1  ;;  %v239_v17 = vld [vmem:[%s368_s4] sm:$0xff]  }
   0x8   :  { %261 = vmatprep.subr.bf16.mxu0 %v279_v2  ;;  %v240_v23 = vunpack.c.l.bf16 %v239_v17  ;;  %v241_v27 = vunpack.c.h.bf16 %v239_v17 }
   0xb   :  { %262 = vmatpush3.bf16.msra.mxu0 %v279_v2 }
   0xc   :  { %263 = vmatprep.subr.bf16.mxu0 %v280_v3 }
   0xf   :  { %264 = vmatpush3.bf16.msra.mxu0 %v280_v3 }
  0x10   :  { %265 = vmatprep.subr.bf16.mxu0 %v281_v5 }
  0x13   :  { %266 = vmatpush3.bf16.msra.mxu0 %v281_v5 }
  0x14   :  { %267 = vmatprep.subr.bf16.mxu0 %v282_v6 }
  0x17   :  { %268 = vmatpush3.bf16.msra.mxu0 %v282_v6 }
  0x18   :  { %269 = vmatprep.subr.bf16.mxu0 %v283_v7 }
  0x1b   :  { %270 = vmatpush3.bf16.msra.mxu0 %v283_v7 }
  0x1c   :  { %271 = vmatprep.subr.bf16.mxu0 %v284_v8 }
  0x1f   :  { %272 = vmatpush3.bf16.msra.mxu0 %v284_v8 }
  0x22   :  { %274 = vmatmul.mubr.bf16.vlgmr.msra.gmra.mxu0 %v286_v9 }
  0xe2   :  { %v275_v12 = vpop.f32.mrf.mxu0 }
  0xe3   :  { %v177_v14 = vmul.f32 %v275_v12, %v230_v10 }
  0xe4   :  { %v142_v16 = vpop.f32.mrf.mxu0 }
  0xe5   :  { %v187_v18 = vadd.f32 %v231_v13, %v177_v14  ;;  %v175_v19 = vmul.f32 %v230_v10, %v142_v16 }
  0xe6   :  { %v276_v20 = vpop.f32.mrf.mxu0 }
  0xe7   :  { %v196_v21 = vadd.f32 %v193_v15, %v187_v18  ;;  %v185_v22 = vadd.f32 %v231_v13, %v175_v19 }
  0xe8   :  { %v145_v24 = vpop.f32.mrf.mxu0 }
  0xe9   :  { %v199_v25 = vmax.f32 %v196_v21, 0.0  ;;  %v176_v26 = vmul.f32 %v230_v10, %v145_v24  ;;  %v194_v29 = vadd.f32 %v240_v23, %v185_v22 }
  0xeb   :  { %v237_v28 = vpack.c.bf16 %v199_v25, %v199_v25  ;;  %v186_v30 = vadd.f32 %v231_v13, %v176_v26  ;;  %v197_v32 = vmax.f32 %v194_v29, 0.0 }
  0xed   :  { %215 = vst [vmem:[%s370_s5 + $0x8] sm:$0xf] %v237_v28  ;;  %v195_v31 = vadd.f32 %v241_v27, %v186_v30 }
  0xef   :  { %v198_v33 = vmax.f32 %v195_v31, 0.0 }
  0xf1   :  { %v245_v34 = vpack.c.bf16 %v198_v33, %v197_v32 }
  0xf3   :  { %246 = vst [vmem:[%s370_s5] sm:$0xff] %v245_v34  }

// kernel: _lambda_.17
= control target key start
LH: loop header
LB: loop body
LE: loop exit
PB: predicated region body
PF: predicated region fallthrough
CT: control target
= control target key end

     0   :  { %v206_v0 = vmov 0.0   ;;  %vm207_vm0 = vmmov 0   ;;  %s269_s1 = inlined_call_operand.vmem [shape: bf16[128,128], index: 1, kind: input, shape index: {}]   ;;  %s270_s0 = inlined_call_operand.vmem [shape: bf16[8,128], index: 0, kind: input, shape index: {}]   ;;  %s271_s2 = inlined_call_operand.vmem [shape: f32[1,128], index: 2, kind: input, shape index: {}]   ;;  %s272_s3 = inlined_call_operand.vmem [shape: f32[1,128], index: 3, kind: input, shape index: {}]   ;;  %s273_s4 = inlined_call_operand.vmem [shape: bf16[8,128], index: 4, kind: output, shape index: {}]  }
   0x1   :  { %176 = vmatprep.subr.bf16.mxu0 %v206_v0  ;;  %v198_v1 = vld [vmem:[%s269_s1 + $0x38] sm:$0xff]   ;;  %192 = vmatprep.mubr.msk.bf16.mxu0 %vm207_vm0, %v206_v0  ;;  %v199_v2 = vld [vmem:[%s269_s1 + $0x30] sm:$0xff]   ;;  %v200_v3 = vld [vmem:[%s269_s1 + $0x28] sm:$0xff]  }
   0x2   :  { %177 = vmatpush3.bf16.msra.mxu0 %v198_v1  ;;  %v201_v4 = vld [vmem:[%s269_s1 + $0x20] sm:$0xff]   ;;  %v202_v5 = vld [vmem:[%s269_s1 + $0x18] sm:$0xff]   ;;  %v203_v6 = vld [vmem:[%s269_s1 + $0x10] sm:$0xff]  }
   0x3   :  { %178 = vmatprep.subr.bf16.mxu0 %v206_v0  ;;  %v204_v7 = vld [vmem:[%s269_s1 + $0x8] sm:$0xff]   ;;  %v205_v8 = vld [vmem:[%s269_s1] sm:$0xff]  }
   0x4   :  { %v24_v9 = vld [vmem:[%s270_s0] sm:$0xf] }
   0x5   :  { %v165_v10 = vld [vmem:[%s271_s2] ss:$0 sm:$0xff] }
   0x6   :  { %179 = vmatpush3.bf16.msra.mxu0 %v199_v2  ;;  %v166_v12 = vld [vmem:[%s272_s3] ss:$0 sm:$0xff] }
   0x7   :  { %180 = vmatprep.subr.bf16.mxu0 %v206_v0 }
   0xa   :  { %181 = vmatpush3.bf16.msra.mxu0 %v200_v3 }
   0xb   :  { %182 = vmatprep.subr.bf16.mxu0 %v206_v0 }
   0xe   :  { %183 = vmatpush3.bf16.msra.mxu0 %v201_v4 }
   0xf   :  { %184 = vmatprep.subr.bf16.mxu0 %v206_v0 }
  0x12   :  { %185 = vmatpush3.bf16.msra.mxu0 %v202_v5 }
  0x13   :  { %186 = vmatprep.subr.bf16.mxu0 %v206_v0 }
  0x16   :  { %187 = vmatpush3.bf16.msra.mxu0 %v203_v6 }
  0x17   :  { %188 = vmatprep.subr.bf16.mxu0 %v206_v0 }
  0x1a   :  { %189 = vmatpush3.bf16.msra.mxu0 %v204_v7 }
  0x1b   :  { %190 = vmatprep.subr.bf16.mxu0 %v206_v0 }
  0x1e   :  { %191 = vmatpush3.bf16.msra.mxu0 %v205_v8 }
  0x21   :  { %193 = vmatmul.mubr.bf16.vlgmr.msra.gmra.mxu0 %v24_v9 }
  0xe1   :  { %v123_v11 = vpop.f32.mrf.mxu0 }
  0xe2   :  { %v142_v13 = vmul.f32 %v165_v10, %v123_v11 }
  0xe3   :  { %v194_v14 = vpop.f32.mrf.mxu0 }
  0xe4   :  { %v150_v15 = vadd.f32 %v166_v12, %v142_v13 }
  0xe5   :  { %v126_v16 = vpop.f32.mrf.mxu0 }
  0xe6   :  { %v151_v17 = vpack.c.bf16 %v150_v15, %v150_v15 }
  0xe7   :  { %v195_v18 = vpop.f32.mrf.mxu0 }
  0xe8   :  { %152 = vst [vmem:[%s273_s4] sm:$0xf] %v151_v17 }

// kernel: _lambda_.19
= control target key start
LH: loop header
LB: loop body
LE: loop exit
PB: predicated region body
PF: predicated region fallthrough
CT: control target
= control target key end

     0   :  { %s934_s15 = smov 0   ;;  %s936_s16 = smov 0   ;;  %s1012_s0 = inlined_call_operand.vmem [shape: bf16[8,1152], index: 0, kind: input, shape index: {}]   ;;  %s1013_s1 = inlined_call_operand.vmem [shape: bf16[1152,128], index: 1, kind: input, shape index: {}]   ;;  %s1014_s2 = inlined_call_operand.vmem [shape: f32[1,128], index: 2, kind: input, shape index: {}]   ;;  %s1015_s3 = inlined_call_operand.vmem [shape: f32[1,128], index: 3, kind: input, shape index: {}]   ;;  %s1016_s4 = inlined_call_operand.vmem [shape: bf16[8,128], index: 4, kind: output, shape index: {}]  }
   0x1   :  { %s938_s17 = smov 0  }
   0x2 LB: > { %s26_s18 = sadd.s32 1, %s900_s16  ;;  %p740_p0 = scmp.ge.s32.totalorder %s904_s17, 1  ;;  %s904_s17 = sphi %s938_s17, %s14_s17   ;;  %s900_s16 = sphi %s936_s16, %s1018_s16   ;;  %s896_s15 = sphi %s934_s15, %s1017_s15  }
   0x3   : > { %p27_p1 = scmp.ge.s32.totalorder %s26_s18, 3  ;;  %p222_p2 = scmp.lt.s32.totalorder %s904_s17, 4 }
   0x5   : > { %s1020_s18 = smov (%p27_p1, %s26_s18), 0  ;;  %p223_p3 = pnand %p740_p0, %p222_p2 }
   0x6   : > { %s268_s19 = smul.u32 (!%p223_p3), 3, %s896_s15  ;;  %p743_p6 = scmp.ne.s32.totalorder (!%p223_p3), %s896_s15, 0 }
   0x7   : > { %226 = sbr.rel (%p223_p3) target bundleno = 274 (0x112), region = 36 }
   0x8   : > { %s278_s20 = smul.u32 (!%p223_p3), 48, %s896_s15  ;;  %p271_p4 = scmp.lt.s32.totalorder (!%p223_p3), %s268_s19, 8 }
   0xa   : > { %p279_p5 = scmp.lt.s32.totalorder (!%p223_p3), %s278_s20, 143 }
   0xc   : > { %s1022_s19 = smov (!%p271_p4, %s268_s19), 8  ;;  %s1024_s20 = smov (!%p279_p5, %s278_s20), 143 }
   0xd   : > { %s741_s21 = sshll.u32 %s1022_s19, 2  ;;  %s742_s25 = sshll.u32 %s1024_s20, 2 }
   0xe   : > { %s959_s24 = scalar_lea.vmem %s1012_s0, %s741_s21  ;;  %s964_s28 = scalar_lea.vmem %s1013_s1, %s742_s25 }
   0xf   : > { %304 = sbr.rel (%p743_p6) target bundleno = 22 (0x16), region = 40 }
  0x14   : > { %v906_v0 = vmov 0.0  }
  0x15   : > { %305 = vst [vmem:[#allocation2] sm:$0xff] %v906_v0 }
  0x16 PF: > { %v855_v1 = vld [vmem:[%s964_s28 + $0x78] sm:$0xff]   ;;  %v907_v2 = vmov 0.0   ;;  %vm908_vm0 = vmmov 0   ;;  %v858_v5 = vld [vmem:[%s964_s28 + $0x70] sm:$0xff]   ;;  %v861_v8 = vld [vmem:[%s964_s28 + $0x68] sm:$0xff]   ;;  %p771_p7 = scmp.ne.s32.totalorder %s896_s15, 2 }
  0x17   : > { %808 = vmatprep.subr.bf16.mxu1 %v907_v2  ;;  %v856_v3 = vld [vmem:[%s964_s28 + $0xb8] sm:$0xff]   ;;  %777 = vmatprep.subr.bf16.mxu0 %v855_v1  ;;  %v859_v6 = vld [vmem:[%s964_s28 + $0xb0] sm:$0xff]   ;;  %v862_v9 = vld [vmem:[%s964_s28 + $0xa8] sm:$0xff]  }
  0x18   : > { %v857_v4 = vld [vmem:[%s964_s28 + $0x38] sm:$0xff]   ;;  %824 = vmatprep.mubr.msk.bf16.mxu1 %vm908_vm0, %v907_v2  ;;  %809 = vmatpush3.bf16.msra.mxu1 %v856_v3  ;;  %v860_v7 = vld [vmem:[%s964_s28 + $0x30] sm:$0xff]   ;;  %v863_v10 = vld [vmem:[%s964_s28 + $0x28] sm:$0xff]  }
  0x19   : > { %778 = vmatpush3.bf16.msra.mxu0 %v857_v4  ;;  %810 = vmatprep.subr.bf16.mxu1 %v907_v2  ;;  %v864_v11 = vld [vmem:[%s964_s28 + $0x60] sm:$0xff]   ;;  %v867_v14 = vld [vmem:[%s964_s28 + $0x58] sm:$0xff]   ;;  %v870_v17 = vld [vmem:[%s964_s28 + $0x50] sm:$0xff]  }
  0x1a   : > { %779 = vmatprep.subr.bf16.mxu0 %v858_v5  ;;  %v865_v12 = vld [vmem:[%s964_s28 + $0xa0] sm:$0xff]   ;;  %v868_v15 = vld [vmem:[%s964_s28 + $0x98] sm:$0xff]   ;;  %v871_v18 = vld [vmem:[%s964_s28 + $0x90] sm:$0xff]  }
  0x1b   : > { %v866_v13 = vld [vmem:[%s964_s28 + $0x20] sm:$0xff]   ;;  %v869_v16 = vld [vmem:[%s964_s28 + $0x18] sm:$0xff]   ;;  %v872_v19 = vld [vmem:[%s964_s28 + $0x10] sm:$0xff]  }
  0x1c   : > { %811 = vmatpush3.bf16.msra.mxu1 %v859_v6  ;;  %v873_v20 = vld [vmem:[%s964_s28 + $0x48] sm:$0xff]   ;;  %v307_v23 = vld [vmem:[%s959_s24] sm:$0xff] }
  0x1d   : > { %780 = vmatpush3.bf16.msra.mxu0 %v860_v7  ;;  %812 = vmatprep.subr.bf16.mxu1 %v907_v2  ;;  %v874_v21 = vld [vmem:[%s964_s28 + $0x88] sm:$0xff]   ;;  %v876_v24 = vld [vmem:[%s964_s28 + $0x40] sm:$0xff]   ;;  %v745_v25 = vcombine.high %v307_v23, %v307_v23  ;;  %v744_v29 = vcombine.low %v307_v23, %v307_v23 }
  0x1e   : > { %781 = vmatprep.subr.bf16.mxu0 %v861_v8  ;;  %v875_v22 = vld [vmem:[%s964_s28 + $0x8] sm:$0xff]   ;;  %v877_v26 = vld [vmem:[%s964_s28 + $0x80] sm:$0xff]  }
  0x1f   : > { %544 = vmatprep.mubr.bf16.mxu0 %v745_v25  ;;  %v878_v27 = vld [vmem:[%s964_s28] sm:$0xff]   ;;  %v881_v28 = vld [vmem:[%s959_s24 + $0x8] ss:$0 sps:$4 sm:$0xff]  }
  0x20   : > { %813 = vmatpush3.bf16.msra.mxu1 %v862_v9  ;;  %v306_v36 = vld [vmem:[#allocation2] sm:$0xff] }
  0x21   : > { %782 = vmatpush3.bf16.msra.mxu0 %v863_v10  ;;  %814 = vmatprep.subr.bf16.mxu1 %v907_v2 }
  0x22   : > { %783 = vmatprep.subr.bf16.mxu0 %v864_v11 }
  0x24   : > { %815 = vmatpush3.bf16.msra.mxu1 %v865_v12 }
  0x25   : > { %784 = vmatpush3.bf16.msra.mxu0 %v866_v13  ;;  %816 = vmatprep.subr.bf16.mxu1 %v907_v2 }
  0x26   : > { %785 = vmatprep.subr.bf16.mxu0 %v867_v14 }
  0x28   : > { %817 = vmatpush3.bf16.msra.mxu1 %v868_v15 }
  0x29   : > { %786 = vmatpush3.bf16.msra.mxu0 %v869_v16  ;;  %818 = vmatprep.subr.bf16.mxu1 %v907_v2 }
  0x2a   : > { %787 = vmatprep.subr.bf16.mxu0 %v870_v17 }
  0x2c   : > { %819 = vmatpush3.bf16.msra.mxu1 %v871_v18 }
  0x2d   : > { %788 = vmatpush3.bf16.msra.mxu0 %v872_v19  ;;  %820 = vmatprep.subr.bf16.mxu1 %v907_v2 }
  0x2e   : > { %789 = vmatprep.subr.bf16.mxu0 %v873_v20 }
  0x30   : > { %821 = vmatpush3.bf16.msra.mxu1 %v874_v21 }
  0x31   : > { %790 = vmatpush3.bf16.msra.mxu0 %v875_v22  ;;  %822 = vmatprep.subr.bf16.mxu1 %v907_v2 }
  0x32   : > { %791 = vmatprep.subr.bf16.mxu0 %v876_v24 }
  0x34   : > { %823 = vmatpush3.bf16.msra.mxu1 %v877_v26 }
  0x35   : > { %792 = vmatpush3.bf16.msra.mxu0 %v878_v27 }
  0x37   : > { %825 = vmatmul.mubr.bf16.vlgmr.msra.gmra.mxu1 %v881_v28 }
  0x38   : > { %545 = vmatmul.mubr.bf16.vlgmr.msra.gmra.mxu0 %v744_v29 }
  0xf7   : > { %v586_v30 = vpop.f32.mrf.mxu1 }
  0xf8   : > { %v793_v31 = vpop.f32.mrf.mxu0 }
  0xf9   : > { %v826_v32 = vpop.f32.mrf.mxu1 }
  0xfa   : > { %v794_v33 = vpop.f32.mrf.mxu0 }
  0xfb   : > { %v795_v34 = vadd.f32 %v794_v33, %v793_v31  ;;  %v589_v35 = vpop.f32.mrf.mxu1 }
  0xfc   : > { %v796_v37 = vpop.f32.mrf.mxu0 }
  0xfd   : > { %v587_v38 = vadd.f32 %v795_v34, %v586_v30  ;;  %v827_v39 = vpop.f32.mrf.mxu1  ;;  %597 = sbr.rel (%p771_p7) target bundleno = 274 (0x112), region = 44 }
  0xfe   : > { %v797_v40 = vpop.f32.mrf.mxu0 }
  0xff   : > { %v592_v41 = vadd.f32 %v587_v38, %v306_v36 }
 0x101   : > { %593 = vst [vmem:[#allocation2] sm:$0xff] %v592_v41 }
 0x102   : > { %v772_v43 = vld [vmem:[%s1014_s2] ss:$0 sm:$0xff] }
 0x103   : > { %v773_v44 = vld [vmem:[%s1015_s3] ss:$0 sm:$0xff] }
 0x108   : > { %v598_v42 = vld [vmem:[#allocation2] sm:$0xff] }
 0x109   : > { %v606_v45 = vmul.f32 %v772_v43, %v598_v42 }
 0x10b   : > { %v614_v46 = vadd.f32 %v773_v44, %v606_v45 }
 0x10d   : > { %v615_v47 = vmax.f32 %v614_v46, 0.0 }
 0x10f   : > { %v616_v48 = vpack.c.bf16 %v615_v47, %v615_v47 }
 0x111   : > { %617 = vst [vmem:[%s1016_s4] sm:$0xf] %v616_v48 }
 0x112 PF: > { %s14_s17 = sadd.s32 1, %s904_s17   ;;  %s1017_s15 = smov %s900_s16 }
 0x113   : > { %p11_p8 = scmp.ge.s32.totalorder %s14_s17, 5   ;;  %s1018_s16 = smov %s1020_s18 }
 0x115   :  { %13 = sbr.rel (!%p11_p8) target bundleno = 2 (0x2), region = 83 }

// kernel: _lambda_.20
= control target key start
LH: loop header
LB: loop body
LE: loop exit
PB: predicated region body
PF: predicated region fallthrough
CT: control target
= control target key end

     0   :  { %v213_v0 = vmov 0.0   ;;  %vm214_vm0 = vmmov 0   ;;  %s284_s1 = inlined_call_operand.vmem [shape: bf16[128,128], index: 1, kind: input, shape index: {}]   ;;  %s285_s0 = inlined_call_operand.vmem [shape: bf16[8,128], index: 0, kind: input, shape index: {}]   ;;  %s286_s2 = inlined_call_operand.vmem [shape: f32[1,128], index: 2, kind: input, shape index: {}]   ;;  %s287_s4 = inlined_call_operand.vmem [shape: bf16[8,128], index: 4, kind: input, shape index: {}]   ;;  %s288_s3 = inlined_call_operand.vmem [shape: f32[1,128], index: 3, kind: input, shape index: {}]   ;;  %s289_s5 = inlined_call_operand.vmem [shape: bf16[8,128], index: 5, kind: output, shape index: {}]  }
   0x1   :  { %183 = vmatprep.subr.bf16.mxu0 %v213_v0  ;;  %v205_v1 = vld [vmem:[%s284_s1 + $0x38] sm:$0xff]   ;;  %199 = vmatprep.mubr.msk.bf16.mxu0 %vm214_vm0, %v213_v0  ;;  %v206_v2 = vld [vmem:[%s284_s1 + $0x30] sm:$0xff]   ;;  %v207_v3 = vld [vmem:[%s284_s1 + $0x28] sm:$0xff]  }
   0x2   :  { %184 = vmatpush3.bf16.msra.mxu0 %v205_v1  ;;  %v208_v4 = vld [vmem:[%s284_s1 + $0x20] sm:$0xff]   ;;  %v209_v5 = vld [vmem:[%s284_s1 + $0x18] sm:$0xff]   ;;  %v210_v6 = vld [vmem:[%s284_s1 + $0x10] sm:$0xff]  }
   0x3   :  { %185 = vmatprep.subr.bf16.mxu0 %v213_v0  ;;  %v211_v7 = vld [vmem:[%s284_s1 + $0x8] sm:$0xff]   ;;  %v212_v8 = vld [vmem:[%s284_s1] sm:$0xff]  }
   0x4   :  { %v27_v9 = vld [vmem:[%s285_s0] sm:$0xf] }
   0x5   :  { %v172_v10 = vld [vmem:[%s286_s2] ss:$0 sm:$0xff] }
   0x6   :  { %186 = vmatpush3.bf16.msra.mxu0 %v206_v2  ;;  %v154_v11 = vld [vmem:[%s287_s4] sm:$0xf] }
   0x7   :  { %187 = vmatprep.subr.bf16.mxu0 %v213_v0  ;;  %v173_v13 = vld [vmem:[%s288_s3] ss:$0 sm:$0xff]  ;;  %v155_v15 = vunpack.c.l.bf16 %v154_v11 }
   0xa   :  { %188 = vmatpush3.bf16.msra.mxu0 %v207_v3 }
   0xb   :  { %189 = vmatprep.subr.bf16.mxu0 %v213_v0 }
   0xe   :  { %190 = vmatpush3.bf16.msra.mxu0 %v208_v4 }
   0xf   :  { %191 = vmatprep.subr.bf16.mxu0 %v213_v0 }
  0x12   :  { %192 = vmatpush3.bf16.msra.mxu0 %v209_v5 }
  0x13   :  { %193 = vmatprep.subr.bf16.mxu0 %v213_v0 }
  0x16   :  { %194 = vmatpush3.bf16.msra.mxu0 %v210_v6 }
  0x17   :  { %195 = vmatprep.subr.bf16.mxu0 %v213_v0 }
  0x1a   :  { %196 = vmatpush3.bf16.msra.mxu0 %v211_v7 }
  0x1b   :  { %197 = vmatprep.subr.bf16.mxu0 %v213_v0 }
  0x1e   :  { %198 = vmatpush3.bf16.msra.mxu0 %v212_v8 }
  0x21   :  { %200 = vmatmul.mubr.bf16.vlgmr.msra.gmra.mxu0 %v27_v9 }
  0xe1   :  { %v126_v12 = vpop.f32.mrf.mxu0 }
  0xe2   :  { %v145_v14 = vmul.f32 %v172_v10, %v126_v12 }
  0xe3   :  { %v201_v16 = vpop.f32.mrf.mxu0 }
  0xe4   :  { %v153_v17 = vadd.f32 %v173_v13, %v145_v14 }
  0xe5   :  { %v129_v18 = vpop.f32.mrf.mxu0 }
  0xe6   :  { %v156_v19 = vadd.f32 %v155_v15, %v153_v17 }
  0xe7   :  { %v202_v20 = vpop.f32.mrf.mxu0 }
  0xe8   :  { %v157_v21 = vmax.f32 %v156_v19, 0.0 }
  0xea   :  { %v158_v22 = vpack.c.bf16 %v157_v21, %v157_v21 }
  0xec   :  { %159 = vst [vmem:[%s289_s5] sm:$0xf] %v158_v22 }

// kernel: _lambda_.21
= control target key start
LH: loop header
LB: loop body
LE: loop exit
PB: predicated region body
PF: predicated region fallthrough
CT: control target
= control target key end

     0   :  { %v572_v1 = vmov 0   ;;  %vm37_vm0 = vcmask 1043456   ;;  %vm154_vm1 = vcmask 1041409   ;;  %vm156_vm2 = vcmask 1042434   ;;  %s743_s1 = inlined_call_operand.vmem [shape: bf16[128,256], index: 1, kind: input, shape index: {}]   ;;  %s744_s0 = inlined_call_operand.vmem [shape: bf16[8,4,128], index: 0, kind: input, shape index: {}]   ;;  %s745_s3 = inlined_call_operand.vmem [shape: bf16[256,128], index: 3, kind: input, shape index: {}]   ;;  %s746_s2 = inlined_call_operand.vmem [shape: f32[1,256], index: 2, kind: input, shape index: {}]   ;;  %s747_s4 = inlined_call_operand.vmem [shape: f32[1,128], index: 4, kind: input, shape index: {}]   ;;  %s748_s5 = inlined_call_operand.vmem [shape: f32[8,128], index: 5, kind: output, shape index: {}]  }
   0x1   :  { %v532_v0 = vld [vmem:[%s743_s1 + $0x74] ss:$8 sps:$4 sm:$0xff]   ;;  %282 = vmatprep.mubr.bf16.mxu0 %v572_v1  ;;  %v534_v2 = vld [vmem:[%s743_s1 + $0x70] ss:$8 sps:$4 sm:$0xff]   ;;  %v535_v3 = vld [vmem:[%s743_s1 + $0x64] ss:$8 sps:$4 sm:$0xff]  }
   0x2   :  { %250 = vmatprep.subr.bf16.mxu0 %v532_v0  ;;  %v537_v4 = vld [vmem:[%s743_s1 + $0x60] ss:$8 sps:$4 sm:$0xff]   ;;  %v538_v5 = vld [vmem:[%s743_s1 + $0x54] ss:$8 sps:$4 sm:$0xff]   ;;  %v540_v6 = vld [vmem:[%s743_s1 + $0x50] ss:$8 sps:$4 sm:$0xff]  }
   0x3   :  { %251 = vmatpush1.bf16.msra.mxu0 %v534_v2  ;;  %v541_v7 = vld [vmem:[%s743_s1 + $0x44] ss:$8 sps:$4 sm:$0xff]   ;;  %v543_v8 = vld [vmem:[%s743_s1 + $0x40] ss:$8 sps:$4 sm:$0xff]   ;;  %v544_v9 = vld [vmem:[%s743_s1 + $0x34] ss:$8 sps:$4 sm:$0xff]  }
   0x4   :  { %252 = vmatprep.subr.bf16.mxu0 %v535_v3  ;;  %v21_v10 = vld [vmem:[%s744_s0] sm:$0x3]  ;;  %v22_v11 = vld [vmem:[%s744_s0 + $0x2] sm:$0x3]  ;;  %v23_v12 = vld [vmem:[%s744_s0 + $0x4] sm:$0x3] }
   0x5   :  { %v24_v13 = vld [vmem:[%s744_s0 + $0x6] sm:$0x3]  ;;  %v29_v14 = vunpack.c.l.bf16 %v21_v10  ;;  %v25_v15 = vld [vmem:[%s744_s0 + $0x8] sm:$0x3]  ;;  %v26_v16 = vld [vmem:[%s744_s0 + $0xa] sm:$0x3]  ;;  %v30_v18 = vunpack.c.l.bf16 %v22_v11  ;;  %v31_v19 = vunpack.c.l.bf16 %v23_v12 }
   0x6   :  { %v27_v17 = vld [vmem:[%s744_s0 + $0xc] sm:$0x3]  ;;  %v32_v20 = vunpack.c.l.bf16 %v24_v13  ;;  %v546_v21 = vld [vmem:[%s743_s1 + $0x30] ss:$8 sps:$4 sm:$0xff]   ;;  %v28_v22 = vld [vmem:[%s744_s0 + $0xe] sm:$0x3]  ;;  %v33_v23 = vunpack.c.l.bf16 %v25_v15  ;;  %v34_v24 = vunpack.c.l.bf16 %v26_v16 }
   0x7   :  { %253 = vmatpush1.bf16.msra.mxu0 %v537_v4  ;;  %v35_v25 = vunpack.c.l.bf16 %v27_v17  ;;  %v38_v26 = vsel %vm37_vm0, %v29_v14, 0.0  ;;  %v556_v27 = vld [vmem:[%s745_s3 + $0x78] sm:$0xff]   ;;  %v547_v28 = vld [vmem:[%s743_s1 + $0x24] ss:$8 sps:$4 sm:$0xff]   ;;  %v36_v29 = vunpack.c.l.bf16 %v28_v22  ;;  %v45_v31 = vsel %vm37_vm0, %v30_v18, 0.0  ;;  %v558_v42 = vld [vmem:[%s745_s3 + $0x70] sm:$0xff]  }
   0x8   :  { %254 = vmatprep.subr.bf16.mxu0 %v538_v5  ;;  %v39_v30 = vrot.slane %v38_v26, 4  ;;  %v52_v32 = vsel %vm37_vm0, %v31_v19, 0.0  ;;  %v557_v33 = vld [vmem:[%s745_s3 + $0x38] sm:$0xff]   ;;  %v46_v34 = vrot.slane %v45_v31, 4  ;;  %v59_v36 = vsel %vm37_vm0, %v32_v20, 0.0  ;;  %509 = vmatprep.subr.bf16.mxu1 %v556_v27  ;;  %v559_v57 = vld [vmem:[%s745_s3 + $0x30] sm:$0xff]  }
   0x9   :  { %v53_v35 = vrot.slane %v52_v32, 4  ;;  %v66_v37 = vsel %vm37_vm0, %v33_v23, 0.0  ;;  %v60_v39 = vrot.slane %v59_v36, 4  ;;  %v73_v41 = vsel %vm37_vm0, %v34_v24, 0.0  ;;  %510 = vmatpush3.bf16.msra.mxu1 %v557_v33  ;;  %v549_v43 = vld [vmem:[%s743_s1 + $0x20] ss:$8 sps:$4 sm:$0xff]  }
   0xa   :  { %v40_v38 = vadd.f32 %v39_v30, %v38_v26  ;;  %v67_v40 = vrot.slane %v66_v37, 4  ;;  %v47_v44 = vadd.f32 %v46_v34, %v45_v31  ;;  %v74_v46 = vrot.slane %v73_v41, 4  ;;  %v550_v48 = vld [vmem:[%s743_s1 + $0x14] ss:$8 sps:$4 sm:$0xff]   ;;  %511 = vmatprep.subr.bf16.mxu1 %v558_v42  ;;  %v560_v62 = vld [vmem:[%s745_s3 + $0x68] sm:$0xff]   ;;  %v562_v14 = vld [vmem:[%s745_s3 + $0x60] sm:$0xff]  }
   0xb   :  { %255 = vmatpush1.bf16.msra.mxu0 %v540_v6  ;;  %v54_v45 = vadd.f32 %v53_v35, %v52_v32  ;;  %v80_v47 = vsel %vm37_vm0, %v35_v25, 0.0  ;;  %v61_v50 = vadd.f32 %v60_v39, %v59_v36  ;;  %v87_v56 = vsel %vm37_vm0, %v36_v29, 0.0  ;;  %v561_v63 = vld [vmem:[%s745_s3 + $0x28] sm:$0xff]   ;;  %v552_v0 = vld [vmem:[%s743_s1 + $0x10] ss:$8 sps:$4 sm:$0xff]   ;;  %v563_v24 = vld [vmem:[%s745_s3 + $0x20] sm:$0xff]  }
   0xc   :  { %256 = vmatprep.subr.bf16.mxu0 %v541_v7  ;;  %v41_v49 = vrot.slane %v40_v38, 2  ;;  %v68_v51 = vadd.f32 %v67_v40, %v66_v37  ;;  %v81_v52 = vrot.slane %v80_v47, 4  ;;  %v48_v53 = vrot.slane %v47_v44, 2  ;;  %v553_v5 = vld [vmem:[%s743_s1 + $0x4] ss:$8 sps:$4 sm:$0xff]   ;;  %v564_v25 = vld [vmem:[%s745_s3 + $0x58] sm:$0xff]  }
   0xd   :  { %v55_v54 = vrot.slane %v54_v45, 2  ;;  %v75_v55 = vadd.f32 %v74_v46, %v73_v41  ;;  %v62_v59 = vrot.slane %v61_v50, 2  ;;  %v88_v4 = vrot.slane %v87_v56, 4  ;;  %512 = vmatpush3.bf16.msra.mxu1 %v559_v57  ;;  %v555_v19 = vld [vmem:[%s743_s1] ss:$8 sps:$4 sm:$0xff]   ;;  %v565_v42 = vld [vmem:[%s745_s3 + $0x18] sm:$0xff]  }
   0xe   :  { %v42_v58 = vadd.f32 %v41_v49, %v40_v38  ;;  %v69_v60 = vrot.slane %v68_v51, 2  ;;  %v82_v61 = vadd.f32 %v81_v52, %v80_v47  ;;  %v49_v1 = vadd.f32 %v48_v53, %v47_v44  ;;  %513 = vmatprep.subr.bf16.mxu1 %v560_v62  ;;  %v566_v47 = vld [vmem:[%s745_s3 + $0x50] sm:$0xff]  }
   0xf   :  { %257 = vmatpush1.bf16.msra.mxu0 %v543_v8  ;;  %v56_v2 = vadd.f32 %v55_v54, %v54_v45  ;;  %v76_v3 = vrot.slane %v75_v55, 2  ;;  %v63_v7 = vadd.f32 %v62_v59, %v61_v50  ;;  %v89_v13 = vadd.f32 %v88_v4, %v87_v56 }
  0x10   :  { %258 = vmatprep.subr.bf16.mxu0 %v544_v9  ;;  %v43_v6 = vrot.slane %v42_v58, 1  ;;  %v70_v8 = vadd.f32 %v69_v60, %v68_v51  ;;  %v83_v9 = vrot.slane %v82_v61, 2  ;;  %v50_v10 = vrot.slane %v49_v1, 1 }
  0x11   :  { %v57_v11 = vrot.slane %v56_v2, 1  ;;  %v77_v12 = vadd.f32 %v76_v3, %v75_v55  ;;  %v64_v16 = vrot.slane %v63_v7, 1  ;;  %vm158_vm3 = vcmask 1043459   ;;  %514 = vmatpush3.bf16.msra.mxu1 %v561_v63 }
  0x12   :  { %v44_v15 = vadd.f32 %v43_v6, %v42_v58  ;;  %v71_v17 = vrot.slane %v70_v8, 1  ;;  %v84_v18 = vadd.f32 %v83_v9, %v82_v61  ;;  %v51_v20 = vadd.f32 %v50_v10, %v49_v1  ;;  %515 = vmatprep.subr.bf16.mxu1 %v562_v14  ;;  %v567_v58 = vld [vmem:[%s745_s3 + $0x10] sm:$0xff]   ;;  %v569_v6 = vld [vmem:[%s745_s3 + $0x8] sm:$0xff]  }
  0x13   :  { %259 = vmatpush1.bf16.msra.mxu0 %v546_v21  ;;  %v58_v21 = vadd.f32 %v57_v11, %v56_v2  ;;  %v78_v22 = vrot.slane %v77_v12, 1  ;;  %v90_v23 = vrot.slane %v89_v13, 2  ;;  %v65_v26 = vadd.f32 %v64_v16, %v63_v7  ;;  %v570_v7 = vld [vmem:[%s745_s3 + $0x40] sm:$0xff]  }
  0x14   :  { %260 = vmatprep.subr.bf16.mxu0 %v547_v28  ;;  %v72_v27 = vadd.f32 %v71_v17, %v70_v8  ;;  %v85_v28 = vrot.slane %v84_v18, 1  ;;  %v94_v29 = vmul.f32 0.25, %v44_v15  ;;  %v95_v32 = vmul.f32 0.25, %v51_v20  ;;  %v571_v8 = vld [vmem:[%s745_s3] sm:$0xff]  }
  0x15   :  { %v79_v30 = vadd.f32 %v78_v22, %v77_v12  ;;  %v91_v31 = vadd.f32 %v90_v23, %v89_v13  ;;  %v96_v33 = vmul.f32 0.25, %v58_v21  ;;  %v97_v35 = vmul.f32 0.25, %v65_v26  ;;  %516 = vmatpush3.bf16.msra.mxu1 %v563_v24  ;;  %v126_v12 = vld [vmem:[%s746_s2] sm:$0x3] }
  0x16   :  { %v86_v34 = vadd.f32 %v85_v28, %v84_v18  ;;  %v98_v36 = vmul.f32 0.25, %v72_v27  ;;  %v102_v37 = vpack.c.bf16 %v94_v29, %v94_v29  ;;  %v103_v40 = vpack.c.bf16 %v95_v32, %v95_v32  ;;  %517 = vmatprep.subr.bf16.mxu1 %v564_v25  ;;  %v492_v27 = vld [vmem:[%s747_s4] ss:$0 sm:$0xff] }
  0x17   :  { %261 = vmatpush1.bf16.msra.mxu0 %v549_v43  ;;  %v92_v38 = vrot.slane %v91_v31, 1  ;;  %v99_v39 = vmul.f32 0.25, %v79_v30  ;;  %v104_v41 = vpack.c.bf16 %v96_v33, %v96_v33  ;;  %v105_v44 = vpack.c.bf16 %v97_v35, %v97_v35 }
  0x18   :  { %262 = vmatprep.subr.bf16.mxu0 %v550_v48  ;;  %v100_v43 = vmul.f32 0.25, %v86_v34  ;;  %v106_v45 = vpack.c.bf16 %v98_v36, %v98_v36  ;;  %v146_v46 = vunpack.c.l.b16 %v102_v37  ;;  %v147_v50 = vunpack.c.l.b16 %v103_v40 }
  0x19   :  { %v93_v48 = vadd.f32 %v92_v38, %v91_v31  ;;  %v107_v49 = vpack.c.bf16 %v99_v39, %v99_v39  ;;  %v148_v51 = vunpack.c.l.b16 %v104_v41  ;;  %v149_v53 = vunpack.c.l.b16 %v105_v44  ;;  %518 = vmatpush3.bf16.msra.mxu1 %v565_v42 }
  0x1a   :  { %v108_v52 = vpack.c.bf16 %v100_v43, %v100_v43  ;;  %v150_v54 = vunpack.c.l.b16 %v106_v45  ;;  %v155_v57 = vsel %vm154_vm1, %v147_v50, %v146_v46  ;;  %vm160_vm4 = vcmask 1044484   ;;  %519 = vmatprep.subr.bf16.mxu1 %v566_v47 }
  0x1b   :  { %263 = vmatpush1.bf16.msra.mxu0 %v552_v0  ;;  %v101_v55 = vmul.f32 0.25, %v93_v48  ;;  %v151_v56 = vunpack.c.l.b16 %v107_v49  ;;  %v157_v60 = vsel %vm156_vm2, %v148_v51, %v155_v57  ;;  %vm162_vm5 = vcmask 1045509  }
  0x1c   :  { %264 = vmatprep.subr.bf16.mxu0 %v553_v5  ;;  %v152_v59 = vunpack.c.l.b16 %v108_v52  ;;  %v159_v62 = vsel %vm158_vm3, %v149_v53, %v157_v60  ;;  %vm164_vm6 = vcmask 1046534   ;;  %vm166_vm7 = vcmask 1047559   ;;  %v568_v5 = vld [vmem:[%s745_s3 + $0x48] sm:$0xff]  }
  0x1d   :  { %v109_v61 = vpack.c.bf16 %v101_v55, %v101_v55  ;;  %v161_v63 = vsel %vm160_vm4, %v150_v54, %v159_v62  ;;  %520 = vmatpush3.bf16.msra.mxu1 %v567_v58  ;;  %v128_v9 = vlaneseq }
  0x1e   :  { %v163_v1 = vsel %vm162_vm5, %v151_v56, %v161_v63  ;;  %521 = vmatprep.subr.bf16.mxu1 %v568_v5 }
  0x1f   :  { %265 = vmatpush1.bf16.msra.mxu0 %v555_v19  ;;  %v153_v0 = vunpack.c.l.b16 %v109_v61  ;;  %v165_v2 = vsel %vm164_vm6, %v152_v59, %v163_v1  ;;  %v129_v10 = vshrl.u32 %v128_v9, 7 }
  0x21   :  { %v167_v3 = vsel %vm166_vm7, %v153_v0, %v165_v2  ;;  %522 = vmatpush3.bf16.msra.mxu1 %v569_v6  ;;  %v130_v11 = vsub.s32 0, %v129_v10  ;;  %v134_v13 = vsub.s32 1, %v129_v10 }
  0x22   :  { %v168_v4 = vpack.c.b16 %v167_v3, %v167_v3  ;;  %523 = vmatprep.subr.bf16.mxu1 %v570_v7 }
  0x23   :  { %v131_v14 = vrot.slane %v126_v12, %v130_v11  ;;  %v135_v15 = vrot.slane %v126_v12, %v134_v13 }
  0x24   :  { %283 = vmatmul.mubr.bf16.vlgmr.msra.gmra.mxu0 %v168_v4 }
  0x25   :  { %524 = vmatpush3.bf16.msra.mxu1 %v571_v8 }
  0xe4   :  { %v284_v16 = vpop.f32.mrf.mxu0 }
  0xe5   :  { %v285_v17 = vadd.f32 %v284_v16, %v131_v14 }
  0xe6   :  { %v286_v18 = vpop.f32.mrf.mxu0 }
  0xe7   :  { %v287_v19 = vadd.f32 %v286_v18, %v135_v15  ;;  %v291_v20 = vmax.f32 %v285_v17, 0.0 }
  0xe8   :  { %v288_v21 = vpop.f32.mrf.mxu0 }
  0xe9   :  { %v292_v22 = vmax.f32 %v287_v19, 0.0  ;;  %v293_v25 = vpack.c.bf16 %v291_v20, %v291_v20 }
  0xea   :  { %v289_v23 = vpop.f32.mrf.mxu0 }
  0xeb   :  { %v294_v24 = vpack.c.bf16 %v292_v22, %v292_v22 }
  0xed   :  { %462 = vmatprep.mubr.bf16.mxu1 %v294_v24 }
  0xee   :  { %463 = vmatmul.mubr.bf16.vlgmr.msra.gmra.mxu1 %v293_v25 }
 0x1ae   :  { %v525_v26 = vpop.f32.mrf.mxu1 }
 0x1b0   :  { %v526_v28 = vpop.f32.mrf.mxu1 }
 0x1b1   :  { %v527_v29 = vadd.f32 %v526_v28, %v525_v26 }
 0x1b2   :  { %v528_v30 = vpop.f32.mrf.mxu1 }
 0x1b3   :  { %v465_v31 = vadd.f32 %v527_v29, %v492_v27 }
 0x1b4   :  { %v529_v32 = vpop.f32.mrf.mxu1 }
 0x1b5   :  { %v470_v33 = vmax.f32 %v465_v31, 0.0 }
 0x1b7   :  { %471 = vst [vmem:[%s748_s5] sm:$0xff] %v470_v33 }

</bundles_post_ra>
